<compile_context>
chip_gen: v7x
topology: tpu7x:2x2x1
jax: 0.10.0
libtpu: 0.0.40
codegen_flags: <defaults>
</compile_context>

<pallas_src>
import functools
import math

import jax
import jax.numpy as jnp
from jax.experimental import pallas as pl
from jax.experimental.pallas import tpu as pltpu

# ----------------------------- hyper-parameters ------------------------------
B = 2            # batch
C_IN = 20        # input_dim (EEG channels)
T = 16           # total time points (module default 100; small here)
S = 8            # last-S timesteps fed to the encoder (module: x[:, -50:, :])
D = 128          # d_model
H = 4            # nhead
DH = D // H      # per-head dim
F = 256          # dim_feedforward
L = 2            # num_layers (module default 6; small here)
OUT = 20         # fc_out output dim (hard-coded 20 in the module)
EPS = 1e-5       # nn.LayerNorm default eps
NEG_INF = -1e30  # cross-batch attention mask value

assert T % S == 0, "last-S slice is taken via the BlockSpec (time block index T//S-1)"


def _layernorm(x, g, b):
    mu = jnp.mean(x, axis=-1, keepdims=True)
    var = jnp.mean((x - mu) ** 2, axis=-1, keepdims=True)
    return (x - mu) * jax.lax.rsqrt(var + EPS) * g + b


def _mm_bf16(a, w_bf16):
    """f32 activations x bf16 weights on the MXU, f32 accumulation."""
    return jnp.dot(a.astype(jnp.bfloat16), w_bf16,
                   preferred_element_type=jnp.float32)


def prepare_params(params):
    """One-time parameter preparation (call ONCE when params are loaded, NOT
    per forward call):
      * heavy weight matrices -> bf16 (halves weight HBM->VMEM DMA)
      * fold 1/sqrt(DH) into the Q output columns of wqkv / bqkv
      * fold emb_b + pos[last S rows] into a single (S, D) bias tile
    # NOTE: on v5e/v6e the heavy weights could additionally be int8-quantized
    # (native MXU int8 path); v7x has no MXU int path, so bf16 is the common
    # denominator kept here.
    """
    (emb_w, emb_b, pos, ln0_g, ln0_b, wqkv, bqkv, wo, bo,
     ln1_g, ln1_b, ln2_g, ln2_b, w1, b1, w2, b2, fc_w, fc_b) = params
    scale = 1.0 / math.sqrt(DH)
    q_scale = jnp.concatenate(
        [jnp.full((1, D), scale, jnp.float32), jnp.ones((1, 2 * D), jnp.float32)],
        axis=-1)                                           # (1, 3D)
    wqkv = wqkv * q_scale                                  # scale Q output columns
    bqkv = bqkv * q_scale
    posb = emb_b + pos[T - S:, :]                          # (S, D) fused bias tile
    return (emb_w.astype(jnp.bfloat16), posb, ln0_g, ln0_b,
            wqkv.astype(jnp.bfloat16), bqkv,
            wo.astype(jnp.bfloat16), bo,
            ln1_g, ln1_b, ln2_g, ln2_b,
            w1.astype(jnp.bfloat16), b1,
            w2.astype(jnp.bfloat16), b2,
            fc_w.astype(jnp.bfloat16), fc_b)


# --------------------------------- kernel ------------------------------------
def eeg_transformer_kernel(
    x_ref,                                   # (Bblk, S, C_IN) f32 (last-S slice)
    emb_w_ref,                               # (C_IN, D) bf16
    posb_ref,                                # (S, D) f32   (emb_b + pos, pre-folded)
    ln0_g_ref, ln0_b_ref,                    # (1, D) f32 x2
    wqkv_ref, bqkv_ref,                      # (L, D, 3D) bf16, (L, 1, 3D) f32
    wo_ref, bo_ref,                          # (L, D, D) bf16, (L, 1, D) f32
    ln1_g_ref, ln1_b_ref,                    # (L, 1, D) f32 x2
    ln2_g_ref, ln2_b_ref,                    # (L, 1, D) f32 x2
    w1_ref, b1_ref,                          # (L, D, F) bf16, (L, 1, F) f32
    w2_ref, b2_ref,                          # (L, F, D) bf16, (L, 1, D) f32
    fc_w_ref, fc_b_ref,                      # (D, OUT) bf16, (1, OUT) f32
    out_ref,                                 # (Bblk, S, OUT) f32
    *, bblk,
):
    m = bblk * S
    # fold batch into the matmul M dimension for all shared-weight ops
    x = x_ref[...].reshape(m, C_IN)                                   # (M, C_IN)

    # embedding + (emb bias + learnable positional encoding) fused bias tile.
    # (S=8, D=128) tiles are (8,128)-aligned so the view reshapes are layout-free.
    h = _mm_bf16(x, emb_w_ref[...])                                   # (M, D)
    h = (h.reshape(bblk, S, D) + posb_ref[...][None]).reshape(m, D)
    h = _layernorm(h, ln0_g_ref[...], ln0_b_ref[...])                 # (M, D)

    # constants hoisted out of the layer / head loops
    lane = jax.lax.broadcasted_iota(jnp.int32, (1, D), 1)
    head_masks = [((lane >= hh * DH) & (lane < (hh + 1) * DH)).astype(jnp.float32)
                  for hh in range(H)]
    if bblk > 1:
        row = jax.lax.broadcasted_iota(jnp.int32, (m, m), 0)
        col = jax.lax.broadcasted_iota(jnp.int32, (m, m), 1)
        same_batch = (row // S) == (col // S)                         # block-diagonal

    for l in range(L):                       # static unroll over layers
        # --- self-attention block (pre-norm); 1/sqrt(DH) pre-folded into wqkv ---
        hn = _layernorm(h, ln1_g_ref[l], ln1_b_ref[l])
        qkv = _mm_bf16(hn, wqkv_ref[l]) + bqkv_ref[l]                 # (M, 3D) f32
        q = qkv[:, 0:D]
        k = qkv[:, D:2 * D]
        v = qkv[:, 2 * D:3 * D]

        attn = None
        for hh in range(H):                  # static unroll over heads
            hm = head_masks[hh]
            # full-width D contraction against lane-masked K: no 32-lane sub-slices
            s = jax.lax.dot_general(q, k * hm, (((1,), (1,)), ((), ())),
                                    preferred_element_type=jnp.float32)   # (M, M)
            if bblk > 1:
                s = jnp.where(same_batch, s, NEG_INF)   # mask cross-batch blocks
            s = s - jnp.max(s, axis=-1, keepdims=True)
            p = jnp.exp(s)
            p = p * pl.reciprocal(jnp.sum(p, axis=-1, keepdims=True), approx=True)
            # P.V against lane-masked full-width V; accumulate into one (M, D)
            pv = jnp.dot(p, v * hm, preferred_element_type=jnp.float32)
            attn = pv if attn is None else attn + pv
        # single (M, D) x (D, D) output projection for all heads
        h = h + _mm_bf16(attn, wo_ref[l]) + bo_ref[l]

        # --- feed-forward block (pre-norm, ReLU); dropout = identity in eval ---
        hn2 = _layernorm(h, ln2_g_ref[l], ln2_b_ref[l])
        ff = jnp.maximum(_mm_bf16(hn2, w1_ref[l]) + b1_ref[l], 0.0)
        h = h + _mm_bf16(ff, w2_ref[l]) + b2_ref[l]

    # fc_out   (OUT=20 < 128 lanes -> masked stores; negligible at this size)
    out = _mm_bf16(h, fc_w_ref[...]) + fc_b_ref[...]                  # (M, OUT)
    out_ref[...] = out.reshape(bblk, S, OUT)


# -------------------------------- wrapper -------------------------------------
def eeg_transformer_forward(x_nct, prepared_params, *, batch_block=B):
    """x_nct: (B, C_IN, T) float32, PyTorch layout.
    prepared_params: output of prepare_params(). Returns (B, OUT, S).
    batch_block=B folds the whole batch into one invocation (default on all
    generations); batch_block=1 gives a B-wide "parallel" grid (v7x 2-TC split)."""
    assert B % batch_block == 0
    bblk = batch_block

    x = jnp.transpose(x_nct, (0, 2, 1)).astype(jnp.float32)           # (B, T, C_IN)
    t_blk = T // S - 1                                                # last-S block index

    def full_spec(arr):
        nd = arr.ndim
        return pl.BlockSpec(arr.shape, lambda b, _nd=nd: (0,) * _nd)

    # x is sliced to the last S timesteps directly by its BlockSpec
    in_specs = [pl.BlockSpec((bblk, S, C_IN), lambda b: (b, t_blk, 0))]
    in_specs += [full_spec(p) for p in prepared_params]

    out = pl.pallas_call(
        functools.partial(eeg_transformer_kernel, bblk=bblk),
        out_shape=jax.ShapeDtypeStruct((B, S, OUT), jnp.float32),
        grid=(B // bblk,),
        in_specs=in_specs,
        out_specs=pl.BlockSpec((bblk, S, OUT), lambda b: (b, 0, 0)),
        compiler_params=pltpu.CompilerParams(
            dimension_semantics=("parallel",)),
    )(x, *prepared_params)

    return jnp.transpose(out, (0, 2, 1))                              # (B, OUT, S)


# ----------------------- deterministic parameter init -------------------------
def init_params(key):
    ks = jax.random.split(key, 20)
    g = lambda k, shape, s=0.05: (s * jax.random.normal(k, shape)).astype(jnp.float32)
    emb_w = g(ks[0], (C_IN, D))
    emb_b = g(ks[1], (1, D))
    pos = g(ks[2], (T, D), 1.0)
    ln0_g = jnp.ones((1, D), jnp.float32)
    ln0_b = jnp.zeros((1, D), jnp.float32)
    wqkv = g(ks[3], (L, D, 3 * D))
    bqkv = g(ks[4], (L, 1, 3 * D))
    wo = g(ks[5], (L, D, D))
    bo = g(ks[6], (L, 1, D))
    ln1_g = jnp.ones((L, 1, D), jnp.float32)
    ln1_b = jnp.zeros((L, 1, D), jnp.float32)
    ln2_g = jnp.ones((L, 1, D), jnp.float32)
    ln2_b = jnp.zeros((L, 1, D), jnp.float32)
    w1 = g(ks[7], (L, D, F))
    b1 = g(ks[8], (L, 1, F))
    w2 = g(ks[9], (L, F, D))
    b2 = g(ks[10], (L, 1, D))
    fc_w = g(ks[11], (D, OUT))
    fc_b = g(ks[12], (1, OUT))
    return (emb_w, emb_b, pos, ln0_g, ln0_b, wqkv, bqkv, wo, bo,
            ln1_g, ln1_b, ln2_g, ln2_b, w1, b1, w2, b2, fc_w, fc_b)


# ---------------------------- pure-JAX references ------------------------------
def reference_forward(x_nct, params):
    """Full-f32 module semantics (slice after LayerNorm, HIGHEST precision)."""
    (emb_w, emb_b, pos, ln0_g, ln0_b, wqkv, bqkv, wo, bo,
     ln1_g, ln1_b, ln2_g, ln2_b, w1, b1, w2, b2, fc_w, fc_b) = params
    hp = jax.lax.Precision.HIGHEST

    def one(xb):                                                     # xb: (T, C_IN)
        h = jnp.dot(xb, emb_w, precision=hp) + emb_b + pos
        h = _layernorm(h, ln0_g, ln0_b)
        h = h[T - S:, :]
        scale = 1.0 / math.sqrt(DH)
        for l in range(L):
            hn = _layernorm(h, ln1_g[l], ln1_b[l])
            qkv = jnp.dot(hn, wqkv[l], precision=hp) + bqkv[l]
            q, k, v = qkv[:, :D], qkv[:, D:2 * D], qkv[:, 2 * D:]
            heads = []
            for hh in range(H):
                lo, hi = hh * DH, (hh + 1) * DH
                s = jnp.dot(q[:, lo:hi], k[:, lo:hi].T, precision=hp) * scale
                p = jax.nn.softmax(s, axis=-1)
                heads.append(jnp.dot(p, v[:, lo:hi], precision=hp))
            attn = jnp.concatenate(heads, axis=-1)
            h = h + jnp.dot(attn, wo[l], precision=hp) + bo[l]
            hn2 = _layernorm(h, ln2_g[l], ln2_b[l])
            ff = jnp.maximum(jnp.dot(hn2, w1[l], precision=hp) + b1[l], 0.0)
            h = h + jnp.dot(ff, w2[l], precision=hp) + b2[l]
        return jnp.dot(h, fc_w, precision=hp) + fc_b

    x = jnp.transpose(x_nct, (0, 2, 1))
    out = jax.vmap(one)(x)                                           # (B, S, OUT)
    return jnp.transpose(out, (0, 2, 1))


def reference_forward_matched(x_nct, prepared):
    """Same bf16-weight / f32-accumulate / pre-folded-scale numerics as the
    kernel (tight check), but with per-head slicing instead of lane masking
    (mathematically identical since masked lanes contribute exact zeros)."""
    (emb_w, posb, ln0_g, ln0_b, wqkv, bqkv, wo, bo,
     ln1_g, ln1_b, ln2_g, ln2_b, w1, b1, w2, b2, fc_w, fc_b) = prepared

    def one(xb):                                                     # xb: (T, C_IN)
        xb = xb[T - S:, :]
        h = _mm_bf16(xb, emb_w) + posb
        h = _layernorm(h, ln0_g, ln0_b)
        for l in range(L):
            hn = _layernorm(h, ln1_g[l], ln1_b[l])
            qkv = _mm_bf16(hn, wqkv[l]) + bqkv[l]
            q, k, v = qkv[:, :D], qkv[:, D:2 * D], qkv[:, 2 * D:]
            heads = []
            for hh in range(H):
                lo, hi = hh * DH, (hh + 1) * DH
                s = jnp.dot(q[:, lo:hi], k[:, lo:hi].T,
                            preferred_element_type=jnp.float32)
                p = jax.nn.softmax(s, axis=-1)
                heads.append(jnp.dot(p, v[:, lo:hi],
                                     preferred_element_type=jnp.float32))
            attn = jnp.concatenate(heads, axis=-1)
            h = h + _mm_bf16(attn, wo[l]) + bo[l]
            hn2 = _layernorm(h, ln2_g[l], ln2_b[l])
            ff = jnp.maximum(_mm_bf16(hn2, w1[l]) + b1[l], 0.0)
            h = h + _mm_bf16(ff, w2[l]) + b2[l]
        return _mm_bf16(h, fc_w) + fc_b

    x = jnp.transpose(x_nct, (0, 2, 1))
    out = jax.vmap(one)(x)                                           # (B, S, OUT)
    return jnp.transpose(out, (0, 2, 1))


# ----------------------------------- main --------------------------------------
if __name__ == "__main__":
    key = jax.random.PRNGKey(0)
    kx, kp = jax.random.split(key)
    x = jax.random.normal(kx, (B, C_IN, T), dtype=jnp.float32)        # (batch, channels, time)
    params = init_params(kp)
    prepared = prepare_params(params)        # one-time prep, outside the jitted path

    y_ref_f32 = reference_forward(x, params)           # full-f32 module semantics
    y_ref_bf16 = reference_forward_matched(x, prepared)  # kernel-matched precision

    # Validate both batch strategies: folded batch (default, all generations)
    # and the B-wide parallel grid (optional v7x 2-TC split).
    for bblk in (1, B):
        fwd = jax.jit(functools.partial(eeg_transformer_forward, batch_block=bblk))
        y = fwd(x, prepared)
        jax.block_until_ready(y)
        assert y.shape == (B, OUT, S), y.shape
        assert bool(jnp.all(jnp.isfinite(y)))
        err_bf = float(jnp.max(jnp.abs(y - y_ref_bf16)))
        err_32 = float(jnp.max(jnp.abs(y - y_ref_f32)))
        assert jnp.allclose(y, y_ref_bf16, atol=1e-2, rtol=1e-2), (bblk, err_bf)
        assert jnp.allclose(y, y_ref_f32, atol=5e-2, rtol=5e-2), (bblk, err_32)

    print("KERNEL_OK")
</pallas_src>

<mosaic_0001>
module attributes {stable_mosaic.version = 11 : i64} {
  func.func @eeg_transformer_kernel(%arg0: i32, %arg1: memref<1x8x20xf32, #tpu.memory_space<vmem>>, %arg2: memref<20x128xbf16, #tpu.memory_space<vmem>>, %arg3: memref<8x128xf32, #tpu.memory_space<vmem>>, %arg4: memref<1x128xf32, #tpu.memory_space<vmem>>, %arg5: memref<1x128xf32, #tpu.memory_space<vmem>>, %arg6: memref<2x128x384xbf16, #tpu.memory_space<vmem>>, %arg7: memref<2x1x384xf32, #tpu.memory_space<vmem>>, %arg8: memref<2x128x128xbf16, #tpu.memory_space<vmem>>, %arg9: memref<2x1x128xf32, #tpu.memory_space<vmem>>, %arg10: memref<2x1x128xf32, #tpu.memory_space<vmem>>, %arg11: memref<2x1x128xf32, #tpu.memory_space<vmem>>, %arg12: memref<2x1x128xf32, #tpu.memory_space<vmem>>, %arg13: memref<2x1x128xf32, #tpu.memory_space<vmem>>, %arg14: memref<2x128x256xbf16, #tpu.memory_space<vmem>>, %arg15: memref<2x1x256xf32, #tpu.memory_space<vmem>>, %arg16: memref<2x256x128xbf16, #tpu.memory_space<vmem>>, %arg17: memref<2x1x128xf32, #tpu.memory_space<vmem>>, %arg18: memref<128x20xbf16, #tpu.memory_space<vmem>>, %arg19: memref<1x20xf32, #tpu.memory_space<vmem>>, %arg20: memref<1x8x20xf32, #tpu.memory_space<vmem>>) attributes {dimension_semantics = [#tpu.dimension_semantics<parallel>], iteration_bounds = array<i64: 2>, scalar_prefetch = 0 : i64, scratch_operands = 0 : i64, tpu.core_type = #tpu.core_type<tc>, window_params = [{transform_indices = @transform_0, window_bounds = array<i64: 1, 8, 20>}, {pipeline_mode = #tpu.pipeline_mode<synchronous>, transform_indices = @transform_1, window_bounds = array<i64: 20, 128>}, {pipeline_mode = #tpu.pipeline_mode<synchronous>, transform_indices = @transform_2, window_bounds = array<i64: 8, 128>}, {pipeline_mode = #tpu.pipeline_mode<synchronous>, transform_indices = @transform_3, window_bounds = array<i64: 1, 128>}, {pipeline_mode = #tpu.pipeline_mode<synchronous>, transform_indices = @transform_4, window_bounds = array<i64: 1, 128>}, {pipeline_mode = #tpu.pipeline_mode<synchronous>, transform_indices = @transform_5, window_bounds = array<i64: 2, 128, 384>}, {pipeline_mode = #tpu.pipeline_mode<synchronous>, transform_indices = @transform_6, window_bounds = array<i64: 2, 1, 384>}, {pipeline_mode = #tpu.pipeline_mode<synchronous>, transform_indices = @transform_7, window_bounds = array<i64: 2, 128, 128>}, {pipeline_mode = #tpu.pipeline_mode<synchronous>, transform_indices = @transform_8, window_bounds = array<i64: 2, 1, 128>}, {pipeline_mode = #tpu.pipeline_mode<synchronous>, transform_indices = @transform_9, window_bounds = array<i64: 2, 1, 128>}, {pipeline_mode = #tpu.pipeline_mode<synchronous>, transform_indices = @transform_10, window_bounds = array<i64: 2, 1, 128>}, {pipeline_mode = #tpu.pipeline_mode<synchronous>, transform_indices = @transform_11, window_bounds = array<i64: 2, 1, 128>}, {pipeline_mode = #tpu.pipeline_mode<synchronous>, transform_indices = @transform_12, window_bounds = array<i64: 2, 1, 128>}, {pipeline_mode = #tpu.pipeline_mode<synchronous>, transform_indices = @transform_13, window_bounds = array<i64: 2, 128, 256>}, {pipeline_mode = #tpu.pipeline_mode<synchronous>, transform_indices = @transform_14, window_bounds = array<i64: 2, 1, 256>}, {pipeline_mode = #tpu.pipeline_mode<synchronous>, transform_indices = @transform_15, window_bounds = array<i64: 2, 256, 128>}, {pipeline_mode = #tpu.pipeline_mode<synchronous>, transform_indices = @transform_16, window_bounds = array<i64: 2, 1, 128>}, {pipeline_mode = #tpu.pipeline_mode<synchronous>, transform_indices = @transform_17, window_bounds = array<i64: 128, 20>}, {pipeline_mode = #tpu.pipeline_mode<synchronous>, transform_indices = @transform_18, window_bounds = array<i64: 1, 20>}, {transform_indices = @transform_19, window_bounds = array<i64: 1, 8, 20>}]} {
    %c0 = arith.constant 0 : index
    %c0_0 = arith.constant 0 : index
    %c0_1 = arith.constant 0 : index
    %0 = vector.load %arg1[%c0, %c0_0, %c0_1] : memref<1x8x20xf32, #tpu.memory_space<vmem>>, vector<1x8x20xf32>
    %1 = vector.shape_cast %0 : vector<1x8x20xf32> to vector<8x20xf32>
    %c0_2 = arith.constant 0 : index
    %c0_3 = arith.constant 0 : index
    %2 = vector.load %arg2[%c0_2, %c0_3] : memref<20x128xbf16, #tpu.memory_space<vmem>>, vector<20x128xbf16>
    %3 = arith.truncf %1 : vector<8x20xf32> to vector<8x20xbf16>
    %cst = arith.constant dense<0.000000e+00> : vector<8x128xf32>
    %4 = tpu.matmul %3, %2, %cst {dimension_numbers = #tpu.dot_dimension_numbers<[1], [0], [0], [1], [0, 0, 1, 1], [], []>} : vector<8x20xbf16>, vector<20x128xbf16>, vector<8x128xf32> -> vector<8x128xf32>
    %5 = vector.shape_cast %4 : vector<8x128xf32> to vector<1x8x128xf32>
    %c0_4 = arith.constant 0 : index
    %c0_5 = arith.constant 0 : index
    %6 = vector.load %arg3[%c0_4, %c0_5] : memref<8x128xf32, #tpu.memory_space<vmem>>, vector<8x128xf32>
    %7 = vector.shape_cast %6 : vector<8x128xf32> to vector<1x8x128xf32>
    %8 = arith.addf %5, %7 : vector<1x8x128xf32>
    %9 = vector.shape_cast %8 : vector<1x8x128xf32> to vector<8x128xf32>
    %c0_6 = arith.constant 0 : index
    %c0_7 = arith.constant 0 : index
    %10 = vector.load %arg4[%c0_6, %c0_7] : memref<1x128xf32, #tpu.memory_space<vmem>>, vector<1x128xf32>
    %c0_8 = arith.constant 0 : index
    %c0_9 = arith.constant 0 : index
    %11 = vector.load %arg5[%c0_8, %c0_9] : memref<1x128xf32, #tpu.memory_space<vmem>>, vector<1x128xf32>
    %cst_10 = arith.constant dense<0.000000e+00> : vector<8xf32>
    %12 = vector.multi_reduction <add>, %9, %cst_10 [1] : vector<8x128xf32> to vector<8xf32>
    %13 = vector.shape_cast %12 : vector<8xf32> to vector<8x1xf32>
    %cst_11 = arith.constant 1.280000e+02 : f32
    %14 = vector.broadcast %cst_11 : f32 to vector<8x1xf32>
    %15 = arith.divf %13, %14 : vector<8x1xf32>
    %16 = vector.broadcast %15 : vector<8x1xf32> to vector<8x128xf32>
    %17 = arith.subf %9, %16 : vector<8x128xf32>
    %18 = arith.mulf %17, %17 : vector<8x128xf32>
    %cst_12 = arith.constant dense<0.000000e+00> : vector<8xf32>
    %19 = vector.multi_reduction <add>, %18, %cst_12 [1] : vector<8x128xf32> to vector<8xf32>
    %20 = vector.shape_cast %19 : vector<8xf32> to vector<8x1xf32>
    %cst_13 = arith.constant 1.280000e+02 : f32
    %21 = vector.broadcast %cst_13 : f32 to vector<8x1xf32>
    %22 = arith.divf %20, %21 : vector<8x1xf32>
    %23 = vector.broadcast %15 : vector<8x1xf32> to vector<8x128xf32>
    %24 = arith.subf %9, %23 : vector<8x128xf32>
    %cst_14 = arith.constant 9.99999974E-6 : f32
    %25 = vector.broadcast %cst_14 : f32 to vector<8x1xf32>
    %26 = arith.addf %22, %25 : vector<8x1xf32>
    %27 = math.rsqrt %26 : vector<8x1xf32>
    %28 = vector.broadcast %27 : vector<8x1xf32> to vector<8x128xf32>
    %29 = arith.mulf %24, %28 : vector<8x128xf32>
    %30 = vector.broadcast %10 : vector<1x128xf32> to vector<8x128xf32>
    %31 = arith.mulf %29, %30 : vector<8x128xf32>
    %32 = vector.broadcast %11 : vector<1x128xf32> to vector<8x128xf32>
    %33 = arith.addf %31, %32 : vector<8x128xf32>
    %34 = tpu.iota {dimensions = array<i32: 1>} : vector<1x128xi32>
    %c0_i32 = arith.constant 0 : i32
    %35 = vector.broadcast %c0_i32 : i32 to vector<1x128xi32>
    %36 = arith.cmpi sge, %34, %35 : vector<1x128xi32>
    %c32_i32 = arith.constant 32 : i32
    %37 = vector.broadcast %c32_i32 : i32 to vector<1x128xi32>
    %38 = arith.cmpi slt, %34, %37 : vector<1x128xi32>
    %39 = arith.andi %36, %38 : vector<1x128xi1>
    %40 = arith.extui %39 : vector<1x128xi1> to vector<1x128xi32>
    %41 = arith.sitofp %40 : vector<1x128xi32> to vector<1x128xf32>
    %c32_i32_15 = arith.constant 32 : i32
    %42 = vector.broadcast %c32_i32_15 : i32 to vector<1x128xi32>
    %43 = arith.cmpi sge, %34, %42 : vector<1x128xi32>
    %c64_i32 = arith.constant 64 : i32
    %44 = vector.broadcast %c64_i32 : i32 to vector<1x128xi32>
    %45 = arith.cmpi slt, %34, %44 : vector<1x128xi32>
    %46 = arith.andi %43, %45 : vector<1x128xi1>
    %47 = arith.extui %46 : vector<1x128xi1> to vector<1x128xi32>
    %48 = arith.sitofp %47 : vector<1x128xi32> to vector<1x128xf32>
    %c64_i32_16 = arith.constant 64 : i32
    %49 = vector.broadcast %c64_i32_16 : i32 to vector<1x128xi32>
    %50 = arith.cmpi sge, %34, %49 : vector<1x128xi32>
    %c96_i32 = arith.constant 96 : i32
    %51 = vector.broadcast %c96_i32 : i32 to vector<1x128xi32>
    %52 = arith.cmpi slt, %34, %51 : vector<1x128xi32>
    %53 = arith.andi %50, %52 : vector<1x128xi1>
    %54 = arith.extui %53 : vector<1x128xi1> to vector<1x128xi32>
    %55 = arith.sitofp %54 : vector<1x128xi32> to vector<1x128xf32>
    %c96_i32_17 = arith.constant 96 : i32
    %56 = vector.broadcast %c96_i32_17 : i32 to vector<1x128xi32>
    %57 = arith.cmpi sge, %34, %56 : vector<1x128xi32>
    %c128_i32 = arith.constant 128 : i32
    %58 = vector.broadcast %c128_i32 : i32 to vector<1x128xi32>
    %59 = arith.cmpi slt, %34, %58 : vector<1x128xi32>
    %60 = arith.andi %57, %59 : vector<1x128xi1>
    %61 = arith.extui %60 : vector<1x128xi1> to vector<1x128xi32>
    %62 = arith.sitofp %61 : vector<1x128xi32> to vector<1x128xf32>
    %c0_18 = arith.constant 0 : index
    %c0_19 = arith.constant 0 : index
    %c0_20 = arith.constant 0 : index
    %63 = vector.load %arg10[%c0_18, %c0_19, %c0_20] : memref<2x1x128xf32, #tpu.memory_space<vmem>>, vector<1x1x128xf32>
    %64 = vector.shape_cast %63 : vector<1x1x128xf32> to vector<1x128xf32>
    %c0_21 = arith.constant 0 : index
    %c0_22 = arith.constant 0 : index
    %c0_23 = arith.constant 0 : index
    %65 = vector.load %arg11[%c0_21, %c0_22, %c0_23] : memref<2x1x128xf32, #tpu.memory_space<vmem>>, vector<1x1x128xf32>
    %66 = vector.shape_cast %65 : vector<1x1x128xf32> to vector<1x128xf32>
    %cst_24 = arith.constant dense<0.000000e+00> : vector<8xf32>
    %67 = vector.multi_reduction <add>, %33, %cst_24 [1] : vector<8x128xf32> to vector<8xf32>
    %68 = vector.shape_cast %67 : vector<8xf32> to vector<8x1xf32>
    %cst_25 = arith.constant 1.280000e+02 : f32
    %69 = vector.broadcast %cst_25 : f32 to vector<8x1xf32>
    %70 = arith.divf %68, %69 : vector<8x1xf32>
    %71 = vector.broadcast %70 : vector<8x1xf32> to vector<8x128xf32>
    %72 = arith.subf %33, %71 : vector<8x128xf32>
    %73 = arith.mulf %72, %72 : vector<8x128xf32>
    %cst_26 = arith.constant dense<0.000000e+00> : vector<8xf32>
    %74 = vector.multi_reduction <add>, %73, %cst_26 [1] : vector<8x128xf32> to vector<8xf32>
    %75 = vector.shape_cast %74 : vector<8xf32> to vector<8x1xf32>
    %cst_27 = arith.constant 1.280000e+02 : f32
    %76 = vector.broadcast %cst_27 : f32 to vector<8x1xf32>
    %77 = arith.divf %75, %76 : vector<8x1xf32>
    %78 = vector.broadcast %70 : vector<8x1xf32> to vector<8x128xf32>
    %79 = arith.subf %33, %78 : vector<8x128xf32>
    %cst_28 = arith.constant 9.99999974E-6 : f32
    %80 = vector.broadcast %cst_28 : f32 to vector<8x1xf32>
    %81 = arith.addf %77, %80 : vector<8x1xf32>
    %82 = math.rsqrt %81 : vector<8x1xf32>
    %83 = vector.broadcast %82 : vector<8x1xf32> to vector<8x128xf32>
    %84 = arith.mulf %79, %83 : vector<8x128xf32>
    %85 = vector.broadcast %64 : vector<1x128xf32> to vector<8x128xf32>
    %86 = arith.mulf %84, %85 : vector<8x128xf32>
    %87 = vector.broadcast %66 : vector<1x128xf32> to vector<8x128xf32>
    %88 = arith.addf %86, %87 : vector<8x128xf32>
    %c0_29 = arith.constant 0 : index
    %c0_30 = arith.constant 0 : index
    %c0_31 = arith.constant 0 : index
    %89 = vector.load %arg6[%c0_29, %c0_30, %c0_31] : memref<2x128x384xbf16, #tpu.memory_space<vmem>>, vector<1x128x384xbf16>
    %90 = vector.shape_cast %89 : vector<1x128x384xbf16> to vector<128x384xbf16>
    %91 = arith.truncf %88 : vector<8x128xf32> to vector<8x128xbf16>
    %cst_32 = arith.constant dense<0.000000e+00> : vector<8x384xf32>
    %92 = tpu.matmul %91, %90, %cst_32 {dimension_numbers = #tpu.dot_dimension_numbers<[1], [0], [0], [1], [0, 0, 1, 1], [], []>} : vector<8x128xbf16>, vector<128x384xbf16>, vector<8x384xf32> -> vector<8x384xf32>
    %c0_33 = arith.constant 0 : index
    %c0_34 = arith.constant 0 : index
    %c0_35 = arith.constant 0 : index
    %93 = vector.load %arg7[%c0_33, %c0_34, %c0_35] : memref<2x1x384xf32, #tpu.memory_space<vmem>>, vector<1x1x384xf32>
    %94 = vector.shape_cast %93 : vector<1x1x384xf32> to vector<1x384xf32>
    %95 = vector.broadcast %94 : vector<1x384xf32> to vector<8x384xf32>
    %96 = arith.addf %92, %95 : vector<8x384xf32>
    %97 = vector.extract_strided_slice %96 {offsets = [0, 0], sizes = [8, 128], strides = [1, 1]} : vector<8x384xf32> to vector<8x128xf32>
    %98 = vector.extract_strided_slice %96 {offsets = [0, 128], sizes = [8, 128], strides = [1, 1]} : vector<8x384xf32> to vector<8x128xf32>
    %99 = vector.extract_strided_slice %96 {offsets = [0, 256], sizes = [8, 128], strides = [1, 1]} : vector<8x384xf32> to vector<8x128xf32>
    %100 = vector.broadcast %41 : vector<1x128xf32> to vector<8x128xf32>
    %101 = arith.mulf %98, %100 : vector<8x128xf32>
    %cst_36 = arith.constant dense<0.000000e+00> : vector<8x8xf32>
    %102 = tpu.matmul %97, %101, %cst_36 {dimension_numbers = #tpu.dot_dimension_numbers<[1], [1], [0], [0], [0, 0, 1, 0], [], []>} : vector<8x128xf32>, vector<8x128xf32>, vector<8x8xf32> -> vector<8x8xf32>
    %cst_37 = arith.constant dense<0xFF800000> : vector<8xf32>
    %103 = vector.multi_reduction <maximumf>, %102, %cst_37 [1] : vector<8x8xf32> to vector<8xf32>
    %104 = vector.shape_cast %103 : vector<8xf32> to vector<8x1xf32>
    %105 = vector.broadcast %104 : vector<8x1xf32> to vector<8x8xf32>
    %106 = arith.subf %102, %105 : vector<8x8xf32>
    %107 = math.exp %106 : vector<8x8xf32>
    %cst_38 = arith.constant dense<0.000000e+00> : vector<8xf32>
    %108 = vector.multi_reduction <add>, %107, %cst_38 [1] : vector<8x8xf32> to vector<8xf32>
    %109 = vector.shape_cast %108 : vector<8xf32> to vector<8x1xf32>
    %110 = tpu.reciprocal %109 {approx = true} : vector<8x1xf32> -> vector<8x1xf32>
    %111 = vector.broadcast %110 : vector<8x1xf32> to vector<8x8xf32>
    %112 = arith.mulf %107, %111 : vector<8x8xf32>
    %113 = vector.broadcast %41 : vector<1x128xf32> to vector<8x128xf32>
    %114 = arith.mulf %99, %113 : vector<8x128xf32>
    %cst_39 = arith.constant dense<0.000000e+00> : vector<8x128xf32>
    %115 = tpu.matmul %112, %114, %cst_39 {dimension_numbers = #tpu.dot_dimension_numbers<[1], [0], [0], [1], [0, 0, 1, 1], [], []>} : vector<8x8xf32>, vector<8x128xf32>, vector<8x128xf32> -> vector<8x128xf32>
    %116 = vector.broadcast %48 : vector<1x128xf32> to vector<8x128xf32>
    %117 = arith.mulf %98, %116 : vector<8x128xf32>
    %cst_40 = arith.constant dense<0.000000e+00> : vector<8x8xf32>
    %118 = tpu.matmul %97, %117, %cst_40 {dimension_numbers = #tpu.dot_dimension_numbers<[1], [1], [0], [0], [0, 0, 1, 0], [], []>} : vector<8x128xf32>, vector<8x128xf32>, vector<8x8xf32> -> vector<8x8xf32>
    %cst_41 = arith.constant dense<0xFF800000> : vector<8xf32>
    %119 = vector.multi_reduction <maximumf>, %118, %cst_41 [1] : vector<8x8xf32> to vector<8xf32>
    %120 = vector.shape_cast %119 : vector<8xf32> to vector<8x1xf32>
    %121 = vector.broadcast %120 : vector<8x1xf32> to vector<8x8xf32>
    %122 = arith.subf %118, %121 : vector<8x8xf32>
    %123 = math.exp %122 : vector<8x8xf32>
    %cst_42 = arith.constant dense<0.000000e+00> : vector<8xf32>
    %124 = vector.multi_reduction <add>, %123, %cst_42 [1] : vector<8x8xf32> to vector<8xf32>
    %125 = vector.shape_cast %124 : vector<8xf32> to vector<8x1xf32>
    %126 = tpu.reciprocal %125 {approx = true} : vector<8x1xf32> -> vector<8x1xf32>
    %127 = vector.broadcast %126 : vector<8x1xf32> to vector<8x8xf32>
    %128 = arith.mulf %123, %127 : vector<8x8xf32>
    %129 = vector.broadcast %48 : vector<1x128xf32> to vector<8x128xf32>
    %130 = arith.mulf %99, %129 : vector<8x128xf32>
    %cst_43 = arith.constant dense<0.000000e+00> : vector<8x128xf32>
    %131 = tpu.matmul %128, %130, %cst_43 {dimension_numbers = #tpu.dot_dimension_numbers<[1], [0], [0], [1], [0, 0, 1, 1], [], []>} : vector<8x8xf32>, vector<8x128xf32>, vector<8x128xf32> -> vector<8x128xf32>
    %132 = arith.addf %115, %131 : vector<8x128xf32>
    %133 = vector.broadcast %55 : vector<1x128xf32> to vector<8x128xf32>
    %134 = arith.mulf %98, %133 : vector<8x128xf32>
    %cst_44 = arith.constant dense<0.000000e+00> : vector<8x8xf32>
    %135 = tpu.matmul %97, %134, %cst_44 {dimension_numbers = #tpu.dot_dimension_numbers<[1], [1], [0], [0], [0, 0, 1, 0], [], []>} : vector<8x128xf32>, vector<8x128xf32>, vector<8x8xf32> -> vector<8x8xf32>
    %cst_45 = arith.constant dense<0xFF800000> : vector<8xf32>
    %136 = vector.multi_reduction <maximumf>, %135, %cst_45 [1] : vector<8x8xf32> to vector<8xf32>
    %137 = vector.shape_cast %136 : vector<8xf32> to vector<8x1xf32>
    %138 = vector.broadcast %137 : vector<8x1xf32> to vector<8x8xf32>
    %139 = arith.subf %135, %138 : vector<8x8xf32>
    %140 = math.exp %139 : vector<8x8xf32>
    %cst_46 = arith.constant dense<0.000000e+00> : vector<8xf32>
    %141 = vector.multi_reduction <add>, %140, %cst_46 [1] : vector<8x8xf32> to vector<8xf32>
    %142 = vector.shape_cast %141 : vector<8xf32> to vector<8x1xf32>
    %143 = tpu.reciprocal %142 {approx = true} : vector<8x1xf32> -> vector<8x1xf32>
    %144 = vector.broadcast %143 : vector<8x1xf32> to vector<8x8xf32>
    %145 = arith.mulf %140, %144 : vector<8x8xf32>
    %146 = vector.broadcast %55 : vector<1x128xf32> to vector<8x128xf32>
    %147 = arith.mulf %99, %146 : vector<8x128xf32>
    %cst_47 = arith.constant dense<0.000000e+00> : vector<8x128xf32>
    %148 = tpu.matmul %145, %147, %cst_47 {dimension_numbers = #tpu.dot_dimension_numbers<[1], [0], [0], [1], [0, 0, 1, 1], [], []>} : vector<8x8xf32>, vector<8x128xf32>, vector<8x128xf32> -> vector<8x128xf32>
    %149 = arith.addf %132, %148 : vector<8x128xf32>
    %150 = vector.broadcast %62 : vector<1x128xf32> to vector<8x128xf32>
    %151 = arith.mulf %98, %150 : vector<8x128xf32>
    %cst_48 = arith.constant dense<0.000000e+00> : vector<8x8xf32>
    %152 = tpu.matmul %97, %151, %cst_48 {dimension_numbers = #tpu.dot_dimension_numbers<[1], [1], [0], [0], [0, 0, 1, 0], [], []>} : vector<8x128xf32>, vector<8x128xf32>, vector<8x8xf32> -> vector<8x8xf32>
    %cst_49 = arith.constant dense<0xFF800000> : vector<8xf32>
    %153 = vector.multi_reduction <maximumf>, %152, %cst_49 [1] : vector<8x8xf32> to vector<8xf32>
    %154 = vector.shape_cast %153 : vector<8xf32> to vector<8x1xf32>
    %155 = vector.broadcast %154 : vector<8x1xf32> to vector<8x8xf32>
    %156 = arith.subf %152, %155 : vector<8x8xf32>
    %157 = math.exp %156 : vector<8x8xf32>
    %cst_50 = arith.constant dense<0.000000e+00> : vector<8xf32>
    %158 = vector.multi_reduction <add>, %157, %cst_50 [1] : vector<8x8xf32> to vector<8xf32>
    %159 = vector.shape_cast %158 : vector<8xf32> to vector<8x1xf32>
    %160 = tpu.reciprocal %159 {approx = true} : vector<8x1xf32> -> vector<8x1xf32>
    %161 = vector.broadcast %160 : vector<8x1xf32> to vector<8x8xf32>
    %162 = arith.mulf %157, %161 : vector<8x8xf32>
    %163 = vector.broadcast %62 : vector<1x128xf32> to vector<8x128xf32>
    %164 = arith.mulf %99, %163 : vector<8x128xf32>
    %cst_51 = arith.constant dense<0.000000e+00> : vector<8x128xf32>
    %165 = tpu.matmul %162, %164, %cst_51 {dimension_numbers = #tpu.dot_dimension_numbers<[1], [0], [0], [1], [0, 0, 1, 1], [], []>} : vector<8x8xf32>, vector<8x128xf32>, vector<8x128xf32> -> vector<8x128xf32>
    %166 = arith.addf %149, %165 : vector<8x128xf32>
    %c0_52 = arith.constant 0 : index
    %c0_53 = arith.constant 0 : index
    %c0_54 = arith.constant 0 : index
    %167 = vector.load %arg8[%c0_52, %c0_53, %c0_54] : memref<2x128x128xbf16, #tpu.memory_space<vmem>>, vector<1x128x128xbf16>
    %168 = vector.shape_cast %167 : vector<1x128x128xbf16> to vector<128x128xbf16>
    %169 = arith.truncf %166 : vector<8x128xf32> to vector<8x128xbf16>
    %cst_55 = arith.constant dense<0.000000e+00> : vector<8x128xf32>
    %170 = tpu.matmul %169, %168, %cst_55 {dimension_numbers = #tpu.dot_dimension_numbers<[1], [0], [0], [1], [0, 0, 1, 1], [], []>} : vector<8x128xbf16>, vector<128x128xbf16>, vector<8x128xf32> -> vector<8x128xf32>
    %171 = arith.addf %33, %170 : vector<8x128xf32>
    %c0_56 = arith.constant 0 : index
    %c0_57 = arith.constant 0 : index
    %c0_58 = arith.constant 0 : index
    %172 = vector.load %arg9[%c0_56, %c0_57, %c0_58] : memref<2x1x128xf32, #tpu.memory_space<vmem>>, vector<1x1x128xf32>
    %173 = vector.shape_cast %172 : vector<1x1x128xf32> to vector<1x128xf32>
    %174 = vector.broadcast %173 : vector<1x128xf32> to vector<8x128xf32>
    %175 = arith.addf %171, %174 : vector<8x128xf32>
    %c0_59 = arith.constant 0 : index
    %c0_60 = arith.constant 0 : index
    %c0_61 = arith.constant 0 : index
    %176 = vector.load %arg12[%c0_59, %c0_60, %c0_61] : memref<2x1x128xf32, #tpu.memory_space<vmem>>, vector<1x1x128xf32>
    %177 = vector.shape_cast %176 : vector<1x1x128xf32> to vector<1x128xf32>
    %c0_62 = arith.constant 0 : index
    %c0_63 = arith.constant 0 : index
    %c0_64 = arith.constant 0 : index
    %178 = vector.load %arg13[%c0_62, %c0_63, %c0_64] : memref<2x1x128xf32, #tpu.memory_space<vmem>>, vector<1x1x128xf32>
    %179 = vector.shape_cast %178 : vector<1x1x128xf32> to vector<1x128xf32>
    %cst_65 = arith.constant dense<0.000000e+00> : vector<8xf32>
    %180 = vector.multi_reduction <add>, %175, %cst_65 [1] : vector<8x128xf32> to vector<8xf32>
    %181 = vector.shape_cast %180 : vector<8xf32> to vector<8x1xf32>
    %cst_66 = arith.constant 1.280000e+02 : f32
    %182 = vector.broadcast %cst_66 : f32 to vector<8x1xf32>
    %183 = arith.divf %181, %182 : vector<8x1xf32>
    %184 = vector.broadcast %183 : vector<8x1xf32> to vector<8x128xf32>
    %185 = arith.subf %175, %184 : vector<8x128xf32>
    %186 = arith.mulf %185, %185 : vector<8x128xf32>
    %cst_67 = arith.constant dense<0.000000e+00> : vector<8xf32>
    %187 = vector.multi_reduction <add>, %186, %cst_67 [1] : vector<8x128xf32> to vector<8xf32>
    %188 = vector.shape_cast %187 : vector<8xf32> to vector<8x1xf32>
    %cst_68 = arith.constant 1.280000e+02 : f32
    %189 = vector.broadcast %cst_68 : f32 to vector<8x1xf32>
    %190 = arith.divf %188, %189 : vector<8x1xf32>
    %191 = vector.broadcast %183 : vector<8x1xf32> to vector<8x128xf32>
    %192 = arith.subf %175, %191 : vector<8x128xf32>
    %cst_69 = arith.constant 9.99999974E-6 : f32
    %193 = vector.broadcast %cst_69 : f32 to vector<8x1xf32>
    %194 = arith.addf %190, %193 : vector<8x1xf32>
    %195 = math.rsqrt %194 : vector<8x1xf32>
    %196 = vector.broadcast %195 : vector<8x1xf32> to vector<8x128xf32>
    %197 = arith.mulf %192, %196 : vector<8x128xf32>
    %198 = vector.broadcast %177 : vector<1x128xf32> to vector<8x128xf32>
    %199 = arith.mulf %197, %198 : vector<8x128xf32>
    %200 = vector.broadcast %179 : vector<1x128xf32> to vector<8x128xf32>
    %201 = arith.addf %199, %200 : vector<8x128xf32>
    %c0_70 = arith.constant 0 : index
    %c0_71 = arith.constant 0 : index
    %c0_72 = arith.constant 0 : index
    %202 = vector.load %arg14[%c0_70, %c0_71, %c0_72] : memref<2x128x256xbf16, #tpu.memory_space<vmem>>, vector<1x128x256xbf16>
    %203 = vector.shape_cast %202 : vector<1x128x256xbf16> to vector<128x256xbf16>
    %204 = arith.truncf %201 : vector<8x128xf32> to vector<8x128xbf16>
    %cst_73 = arith.constant dense<0.000000e+00> : vector<8x256xf32>
    %205 = tpu.matmul %204, %203, %cst_73 {dimension_numbers = #tpu.dot_dimension_numbers<[1], [0], [0], [1], [0, 0, 1, 1], [], []>} : vector<8x128xbf16>, vector<128x256xbf16>, vector<8x256xf32> -> vector<8x256xf32>
    %c0_74 = arith.constant 0 : index
    %c0_75 = arith.constant 0 : index
    %c0_76 = arith.constant 0 : index
    %206 = vector.load %arg15[%c0_74, %c0_75, %c0_76] : memref<2x1x256xf32, #tpu.memory_space<vmem>>, vector<1x1x256xf32>
    %207 = vector.shape_cast %206 : vector<1x1x256xf32> to vector<1x256xf32>
    %208 = vector.broadcast %207 : vector<1x256xf32> to vector<8x256xf32>
    %209 = arith.addf %205, %208 : vector<8x256xf32>
    %cst_77 = arith.constant 0.000000e+00 : f32
    %210 = vector.broadcast %cst_77 : f32 to vector<8x256xf32>
    %211 = arith.maximumf %209, %210 : vector<8x256xf32>
    %c0_78 = arith.constant 0 : index
    %c0_79 = arith.constant 0 : index
    %c0_80 = arith.constant 0 : index
    %212 = vector.load %arg16[%c0_78, %c0_79, %c0_80] : memref<2x256x128xbf16, #tpu.memory_space<vmem>>, vector<1x256x128xbf16>
    %213 = vector.shape_cast %212 : vector<1x256x128xbf16> to vector<256x128xbf16>
    %214 = arith.truncf %211 : vector<8x256xf32> to vector<8x256xbf16>
    %cst_81 = arith.constant dense<0.000000e+00> : vector<8x128xf32>
    %215 = tpu.matmul %214, %213, %cst_81 {dimension_numbers = #tpu.dot_dimension_numbers<[1], [0], [0], [1], [0, 0, 1, 1], [], []>} : vector<8x256xbf16>, vector<256x128xbf16>, vector<8x128xf32> -> vector<8x128xf32>
    %216 = arith.addf %175, %215 : vector<8x128xf32>
    %c0_82 = arith.constant 0 : index
    %c0_83 = arith.constant 0 : index
    %c0_84 = arith.constant 0 : index
    %217 = vector.load %arg17[%c0_82, %c0_83, %c0_84] : memref<2x1x128xf32, #tpu.memory_space<vmem>>, vector<1x1x128xf32>
    %218 = vector.shape_cast %217 : vector<1x1x128xf32> to vector<1x128xf32>
    %219 = vector.broadcast %218 : vector<1x128xf32> to vector<8x128xf32>
    %220 = arith.addf %216, %219 : vector<8x128xf32>
    %c1 = arith.constant 1 : index
    %c0_85 = arith.constant 0 : index
    %c0_86 = arith.constant 0 : index
    %221 = vector.load %arg10[%c1, %c0_85, %c0_86] : memref<2x1x128xf32, #tpu.memory_space<vmem>>, vector<1x1x128xf32>
    %222 = vector.shape_cast %221 : vector<1x1x128xf32> to vector<1x128xf32>
    %c1_87 = arith.constant 1 : index
    %c0_88 = arith.constant 0 : index
    %c0_89 = arith.constant 0 : index
    %223 = vector.load %arg11[%c1_87, %c0_88, %c0_89] : memref<2x1x128xf32, #tpu.memory_space<vmem>>, vector<1x1x128xf32>
    %224 = vector.shape_cast %223 : vector<1x1x128xf32> to vector<1x128xf32>
    %cst_90 = arith.constant dense<0.000000e+00> : vector<8xf32>
    %225 = vector.multi_reduction <add>, %220, %cst_90 [1] : vector<8x128xf32> to vector<8xf32>
    %226 = vector.shape_cast %225 : vector<8xf32> to vector<8x1xf32>
    %cst_91 = arith.constant 1.280000e+02 : f32
    %227 = vector.broadcast %cst_91 : f32 to vector<8x1xf32>
    %228 = arith.divf %226, %227 : vector<8x1xf32>
    %229 = vector.broadcast %228 : vector<8x1xf32> to vector<8x128xf32>
    %230 = arith.subf %220, %229 : vector<8x128xf32>
    %231 = arith.mulf %230, %230 : vector<8x128xf32>
    %cst_92 = arith.constant dense<0.000000e+00> : vector<8xf32>
    %232 = vector.multi_reduction <add>, %231, %cst_92 [1] : vector<8x128xf32> to vector<8xf32>
    %233 = vector.shape_cast %232 : vector<8xf32> to vector<8x1xf32>
    %cst_93 = arith.constant 1.280000e+02 : f32
    %234 = vector.broadcast %cst_93 : f32 to vector<8x1xf32>
    %235 = arith.divf %233, %234 : vector<8x1xf32>
    %236 = vector.broadcast %228 : vector<8x1xf32> to vector<8x128xf32>
    %237 = arith.subf %220, %236 : vector<8x128xf32>
    %cst_94 = arith.constant 9.99999974E-6 : f32
    %238 = vector.broadcast %cst_94 : f32 to vector<8x1xf32>
    %239 = arith.addf %235, %238 : vector<8x1xf32>
    %240 = math.rsqrt %239 : vector<8x1xf32>
    %241 = vector.broadcast %240 : vector<8x1xf32> to vector<8x128xf32>
    %242 = arith.mulf %237, %241 : vector<8x128xf32>
    %243 = vector.broadcast %222 : vector<1x128xf32> to vector<8x128xf32>
    %244 = arith.mulf %242, %243 : vector<8x128xf32>
    %245 = vector.broadcast %224 : vector<1x128xf32> to vector<8x128xf32>
    %246 = arith.addf %244, %245 : vector<8x128xf32>
    %c1_95 = arith.constant 1 : index
    %c0_96 = arith.constant 0 : index
    %c0_97 = arith.constant 0 : index
    %247 = vector.load %arg6[%c1_95, %c0_96, %c0_97] : memref<2x128x384xbf16, #tpu.memory_space<vmem>>, vector<1x128x384xbf16>
    %248 = vector.shape_cast %247 : vector<1x128x384xbf16> to vector<128x384xbf16>
    %249 = arith.truncf %246 : vector<8x128xf32> to vector<8x128xbf16>
    %cst_98 = arith.constant dense<0.000000e+00> : vector<8x384xf32>
    %250 = tpu.matmul %249, %248, %cst_98 {dimension_numbers = #tpu.dot_dimension_numbers<[1], [0], [0], [1], [0, 0, 1, 1], [], []>} : vector<8x128xbf16>, vector<128x384xbf16>, vector<8x384xf32> -> vector<8x384xf32>
    %c1_99 = arith.constant 1 : index
    %c0_100 = arith.constant 0 : index
    %c0_101 = arith.constant 0 : index
    %251 = vector.load %arg7[%c1_99, %c0_100, %c0_101] : memref<2x1x384xf32, #tpu.memory_space<vmem>>, vector<1x1x384xf32>
    %252 = vector.shape_cast %251 : vector<1x1x384xf32> to vector<1x384xf32>
    %253 = vector.broadcast %252 : vector<1x384xf32> to vector<8x384xf32>
    %254 = arith.addf %250, %253 : vector<8x384xf32>
    %255 = vector.extract_strided_slice %254 {offsets = [0, 0], sizes = [8, 128], strides = [1, 1]} : vector<8x384xf32> to vector<8x128xf32>
    %256 = vector.extract_strided_slice %254 {offsets = [0, 128], sizes = [8, 128], strides = [1, 1]} : vector<8x384xf32> to vector<8x128xf32>
    %257 = vector.extract_strided_slice %254 {offsets = [0, 256], sizes = [8, 128], strides = [1, 1]} : vector<8x384xf32> to vector<8x128xf32>
    %258 = vector.broadcast %41 : vector<1x128xf32> to vector<8x128xf32>
    %259 = arith.mulf %256, %258 : vector<8x128xf32>
    %cst_102 = arith.constant dense<0.000000e+00> : vector<8x8xf32>
    %260 = tpu.matmul %255, %259, %cst_102 {dimension_numbers = #tpu.dot_dimension_numbers<[1], [1], [0], [0], [0, 0, 1, 0], [], []>} : vector<8x128xf32>, vector<8x128xf32>, vector<8x8xf32> -> vector<8x8xf32>
    %cst_103 = arith.constant dense<0xFF800000> : vector<8xf32>
    %261 = vector.multi_reduction <maximumf>, %260, %cst_103 [1] : vector<8x8xf32> to vector<8xf32>
    %262 = vector.shape_cast %261 : vector<8xf32> to vector<8x1xf32>
    %263 = vector.broadcast %262 : vector<8x1xf32> to vector<8x8xf32>
    %264 = arith.subf %260, %263 : vector<8x8xf32>
    %265 = math.exp %264 : vector<8x8xf32>
    %cst_104 = arith.constant dense<0.000000e+00> : vector<8xf32>
    %266 = vector.multi_reduction <add>, %265, %cst_104 [1] : vector<8x8xf32> to vector<8xf32>
    %267 = vector.shape_cast %266 : vector<8xf32> to vector<8x1xf32>
    %268 = tpu.reciprocal %267 {approx = true} : vector<8x1xf32> -> vector<8x1xf32>
    %269 = vector.broadcast %268 : vector<8x1xf32> to vector<8x8xf32>
    %270 = arith.mulf %265, %269 : vector<8x8xf32>
    %271 = vector.broadcast %41 : vector<1x128xf32> to vector<8x128xf32>
    %272 = arith.mulf %257, %271 : vector<8x128xf32>
    %cst_105 = arith.constant dense<0.000000e+00> : vector<8x128xf32>
    %273 = tpu.matmul %270, %272, %cst_105 {dimension_numbers = #tpu.dot_dimension_numbers<[1], [0], [0], [1], [0, 0, 1, 1], [], []>} : vector<8x8xf32>, vector<8x128xf32>, vector<8x128xf32> -> vector<8x128xf32>
    %274 = vector.broadcast %48 : vector<1x128xf32> to vector<8x128xf32>
    %275 = arith.mulf %256, %274 : vector<8x128xf32>
    %cst_106 = arith.constant dense<0.000000e+00> : vector<8x8xf32>
    %276 = tpu.matmul %255, %275, %cst_106 {dimension_numbers = #tpu.dot_dimension_numbers<[1], [1], [0], [0], [0, 0, 1, 0], [], []>} : vector<8x128xf32>, vector<8x128xf32>, vector<8x8xf32> -> vector<8x8xf32>
    %cst_107 = arith.constant dense<0xFF800000> : vector<8xf32>
    %277 = vector.multi_reduction <maximumf>, %276, %cst_107 [1] : vector<8x8xf32> to vector<8xf32>
    %278 = vector.shape_cast %277 : vector<8xf32> to vector<8x1xf32>
    %279 = vector.broadcast %278 : vector<8x1xf32> to vector<8x8xf32>
    %280 = arith.subf %276, %279 : vector<8x8xf32>
    %281 = math.exp %280 : vector<8x8xf32>
    %cst_108 = arith.constant dense<0.000000e+00> : vector<8xf32>
    %282 = vector.multi_reduction <add>, %281, %cst_108 [1] : vector<8x8xf32> to vector<8xf32>
    %283 = vector.shape_cast %282 : vector<8xf32> to vector<8x1xf32>
    %284 = tpu.reciprocal %283 {approx = true} : vector<8x1xf32> -> vector<8x1xf32>
    %285 = vector.broadcast %284 : vector<8x1xf32> to vector<8x8xf32>
    %286 = arith.mulf %281, %285 : vector<8x8xf32>
    %287 = vector.broadcast %48 : vector<1x128xf32> to vector<8x128xf32>
    %288 = arith.mulf %257, %287 : vector<8x128xf32>
    %cst_109 = arith.constant dense<0.000000e+00> : vector<8x128xf32>
    %289 = tpu.matmul %286, %288, %cst_109 {dimension_numbers = #tpu.dot_dimension_numbers<[1], [0], [0], [1], [0, 0, 1, 1], [], []>} : vector<8x8xf32>, vector<8x128xf32>, vector<8x128xf32> -> vector<8x128xf32>
    %290 = arith.addf %273, %289 : vector<8x128xf32>
    %291 = vector.broadcast %55 : vector<1x128xf32> to vector<8x128xf32>
    %292 = arith.mulf %256, %291 : vector<8x128xf32>
    %cst_110 = arith.constant dense<0.000000e+00> : vector<8x8xf32>
    %293 = tpu.matmul %255, %292, %cst_110 {dimension_numbers = #tpu.dot_dimension_numbers<[1], [1], [0], [0], [0, 0, 1, 0], [], []>} : vector<8x128xf32>, vector<8x128xf32>, vector<8x8xf32> -> vector<8x8xf32>
    %cst_111 = arith.constant dense<0xFF800000> : vector<8xf32>
    %294 = vector.multi_reduction <maximumf>, %293, %cst_111 [1] : vector<8x8xf32> to vector<8xf32>
    %295 = vector.shape_cast %294 : vector<8xf32> to vector<8x1xf32>
    %296 = vector.broadcast %295 : vector<8x1xf32> to vector<8x8xf32>
    %297 = arith.subf %293, %296 : vector<8x8xf32>
    %298 = math.exp %297 : vector<8x8xf32>
    %cst_112 = arith.constant dense<0.000000e+00> : vector<8xf32>
    %299 = vector.multi_reduction <add>, %298, %cst_112 [1] : vector<8x8xf32> to vector<8xf32>
    %300 = vector.shape_cast %299 : vector<8xf32> to vector<8x1xf32>
    %301 = tpu.reciprocal %300 {approx = true} : vector<8x1xf32> -> vector<8x1xf32>
    %302 = vector.broadcast %301 : vector<8x1xf32> to vector<8x8xf32>
    %303 = arith.mulf %298, %302 : vector<8x8xf32>
    %304 = vector.broadcast %55 : vector<1x128xf32> to vector<8x128xf32>
    %305 = arith.mulf %257, %304 : vector<8x128xf32>
    %cst_113 = arith.constant dense<0.000000e+00> : vector<8x128xf32>
    %306 = tpu.matmul %303, %305, %cst_113 {dimension_numbers = #tpu.dot_dimension_numbers<[1], [0], [0], [1], [0, 0, 1, 1], [], []>} : vector<8x8xf32>, vector<8x128xf32>, vector<8x128xf32> -> vector<8x128xf32>
    %307 = arith.addf %290, %306 : vector<8x128xf32>
    %308 = vector.broadcast %62 : vector<1x128xf32> to vector<8x128xf32>
    %309 = arith.mulf %256, %308 : vector<8x128xf32>
    %cst_114 = arith.constant dense<0.000000e+00> : vector<8x8xf32>
    %310 = tpu.matmul %255, %309, %cst_114 {dimension_numbers = #tpu.dot_dimension_numbers<[1], [1], [0], [0], [0, 0, 1, 0], [], []>} : vector<8x128xf32>, vector<8x128xf32>, vector<8x8xf32> -> vector<8x8xf32>
    %cst_115 = arith.constant dense<0xFF800000> : vector<8xf32>
    %311 = vector.multi_reduction <maximumf>, %310, %cst_115 [1] : vector<8x8xf32> to vector<8xf32>
    %312 = vector.shape_cast %311 : vector<8xf32> to vector<8x1xf32>
    %313 = vector.broadcast %312 : vector<8x1xf32> to vector<8x8xf32>
    %314 = arith.subf %310, %313 : vector<8x8xf32>
    %315 = math.exp %314 : vector<8x8xf32>
    %cst_116 = arith.constant dense<0.000000e+00> : vector<8xf32>
    %316 = vector.multi_reduction <add>, %315, %cst_116 [1] : vector<8x8xf32> to vector<8xf32>
    %317 = vector.shape_cast %316 : vector<8xf32> to vector<8x1xf32>
    %318 = tpu.reciprocal %317 {approx = true} : vector<8x1xf32> -> vector<8x1xf32>
    %319 = vector.broadcast %318 : vector<8x1xf32> to vector<8x8xf32>
    %320 = arith.mulf %315, %319 : vector<8x8xf32>
    %321 = vector.broadcast %62 : vector<1x128xf32> to vector<8x128xf32>
    %322 = arith.mulf %257, %321 : vector<8x128xf32>
    %cst_117 = arith.constant dense<0.000000e+00> : vector<8x128xf32>
    %323 = tpu.matmul %320, %322, %cst_117 {dimension_numbers = #tpu.dot_dimension_numbers<[1], [0], [0], [1], [0, 0, 1, 1], [], []>} : vector<8x8xf32>, vector<8x128xf32>, vector<8x128xf32> -> vector<8x128xf32>
    %324 = arith.addf %307, %323 : vector<8x128xf32>
    %c1_118 = arith.constant 1 : index
    %c0_119 = arith.constant 0 : index
    %c0_120 = arith.constant 0 : index
    %325 = vector.load %arg8[%c1_118, %c0_119, %c0_120] : memref<2x128x128xbf16, #tpu.memory_space<vmem>>, vector<1x128x128xbf16>
    %326 = vector.shape_cast %325 : vector<1x128x128xbf16> to vector<128x128xbf16>
    %327 = arith.truncf %324 : vector<8x128xf32> to vector<8x128xbf16>
    %cst_121 = arith.constant dense<0.000000e+00> : vector<8x128xf32>
    %328 = tpu.matmul %327, %326, %cst_121 {dimension_numbers = #tpu.dot_dimension_numbers<[1], [0], [0], [1], [0, 0, 1, 1], [], []>} : vector<8x128xbf16>, vector<128x128xbf16>, vector<8x128xf32> -> vector<8x128xf32>
    %329 = arith.addf %220, %328 : vector<8x128xf32>
    %c1_122 = arith.constant 1 : index
    %c0_123 = arith.constant 0 : index
    %c0_124 = arith.constant 0 : index
    %330 = vector.load %arg9[%c1_122, %c0_123, %c0_124] : memref<2x1x128xf32, #tpu.memory_space<vmem>>, vector<1x1x128xf32>
    %331 = vector.shape_cast %330 : vector<1x1x128xf32> to vector<1x128xf32>
    %332 = vector.broadcast %331 : vector<1x128xf32> to vector<8x128xf32>
    %333 = arith.addf %329, %332 : vector<8x128xf32>
    %c1_125 = arith.constant 1 : index
    %c0_126 = arith.constant 0 : index
    %c0_127 = arith.constant 0 : index
    %334 = vector.load %arg12[%c1_125, %c0_126, %c0_127] : memref<2x1x128xf32, #tpu.memory_space<vmem>>, vector<1x1x128xf32>
    %335 = vector.shape_cast %334 : vector<1x1x128xf32> to vector<1x128xf32>
    %c1_128 = arith.constant 1 : index
    %c0_129 = arith.constant 0 : index
    %c0_130 = arith.constant 0 : index
    %336 = vector.load %arg13[%c1_128, %c0_129, %c0_130] : memref<2x1x128xf32, #tpu.memory_space<vmem>>, vector<1x1x128xf32>
    %337 = vector.shape_cast %336 : vector<1x1x128xf32> to vector<1x128xf32>
    %cst_131 = arith.constant dense<0.000000e+00> : vector<8xf32>
    %338 = vector.multi_reduction <add>, %333, %cst_131 [1] : vector<8x128xf32> to vector<8xf32>
    %339 = vector.shape_cast %338 : vector<8xf32> to vector<8x1xf32>
    %cst_132 = arith.constant 1.280000e+02 : f32
    %340 = vector.broadcast %cst_132 : f32 to vector<8x1xf32>
    %341 = arith.divf %339, %340 : vector<8x1xf32>
    %342 = vector.broadcast %341 : vector<8x1xf32> to vector<8x128xf32>
    %343 = arith.subf %333, %342 : vector<8x128xf32>
    %344 = arith.mulf %343, %343 : vector<8x128xf32>
    %cst_133 = arith.constant dense<0.000000e+00> : vector<8xf32>
    %345 = vector.multi_reduction <add>, %344, %cst_133 [1] : vector<8x128xf32> to vector<8xf32>
    %346 = vector.shape_cast %345 : vector<8xf32> to vector<8x1xf32>
    %cst_134 = arith.constant 1.280000e+02 : f32
    %347 = vector.broadcast %cst_134 : f32 to vector<8x1xf32>
    %348 = arith.divf %346, %347 : vector<8x1xf32>
    %349 = vector.broadcast %341 : vector<8x1xf32> to vector<8x128xf32>
    %350 = arith.subf %333, %349 : vector<8x128xf32>
    %cst_135 = arith.constant 9.99999974E-6 : f32
    %351 = vector.broadcast %cst_135 : f32 to vector<8x1xf32>
    %352 = arith.addf %348, %351 : vector<8x1xf32>
    %353 = math.rsqrt %352 : vector<8x1xf32>
    %354 = vector.broadcast %353 : vector<8x1xf32> to vector<8x128xf32>
    %355 = arith.mulf %350, %354 : vector<8x128xf32>
    %356 = vector.broadcast %335 : vector<1x128xf32> to vector<8x128xf32>
    %357 = arith.mulf %355, %356 : vector<8x128xf32>
    %358 = vector.broadcast %337 : vector<1x128xf32> to vector<8x128xf32>
    %359 = arith.addf %357, %358 : vector<8x128xf32>
    %c1_136 = arith.constant 1 : index
    %c0_137 = arith.constant 0 : index
    %c0_138 = arith.constant 0 : index
    %360 = vector.load %arg14[%c1_136, %c0_137, %c0_138] : memref<2x128x256xbf16, #tpu.memory_space<vmem>>, vector<1x128x256xbf16>
    %361 = vector.shape_cast %360 : vector<1x128x256xbf16> to vector<128x256xbf16>
    %362 = arith.truncf %359 : vector<8x128xf32> to vector<8x128xbf16>
    %cst_139 = arith.constant dense<0.000000e+00> : vector<8x256xf32>
    %363 = tpu.matmul %362, %361, %cst_139 {dimension_numbers = #tpu.dot_dimension_numbers<[1], [0], [0], [1], [0, 0, 1, 1], [], []>} : vector<8x128xbf16>, vector<128x256xbf16>, vector<8x256xf32> -> vector<8x256xf32>
    %c1_140 = arith.constant 1 : index
    %c0_141 = arith.constant 0 : index
    %c0_142 = arith.constant 0 : index
    %364 = vector.load %arg15[%c1_140, %c0_141, %c0_142] : memref<2x1x256xf32, #tpu.memory_space<vmem>>, vector<1x1x256xf32>
    %365 = vector.shape_cast %364 : vector<1x1x256xf32> to vector<1x256xf32>
    %366 = vector.broadcast %365 : vector<1x256xf32> to vector<8x256xf32>
    %367 = arith.addf %363, %366 : vector<8x256xf32>
    %cst_143 = arith.constant 0.000000e+00 : f32
    %368 = vector.broadcast %cst_143 : f32 to vector<8x256xf32>
    %369 = arith.maximumf %367, %368 : vector<8x256xf32>
    %c1_144 = arith.constant 1 : index
    %c0_145 = arith.constant 0 : index
    %c0_146 = arith.constant 0 : index
    %370 = vector.load %arg16[%c1_144, %c0_145, %c0_146] : memref<2x256x128xbf16, #tpu.memory_space<vmem>>, vector<1x256x128xbf16>
    %371 = vector.shape_cast %370 : vector<1x256x128xbf16> to vector<256x128xbf16>
    %372 = arith.truncf %369 : vector<8x256xf32> to vector<8x256xbf16>
    %cst_147 = arith.constant dense<0.000000e+00> : vector<8x128xf32>
    %373 = tpu.matmul %372, %371, %cst_147 {dimension_numbers = #tpu.dot_dimension_numbers<[1], [0], [0], [1], [0, 0, 1, 1], [], []>} : vector<8x256xbf16>, vector<256x128xbf16>, vector<8x128xf32> -> vector<8x128xf32>
    %374 = arith.addf %333, %373 : vector<8x128xf32>
    %c1_148 = arith.constant 1 : index
    %c0_149 = arith.constant 0 : index
    %c0_150 = arith.constant 0 : index
    %375 = vector.load %arg17[%c1_148, %c0_149, %c0_150] : memref<2x1x128xf32, #tpu.memory_space<vmem>>, vector<1x1x128xf32>
    %376 = vector.shape_cast %375 : vector<1x1x128xf32> to vector<1x128xf32>
    %377 = vector.broadcast %376 : vector<1x128xf32> to vector<8x128xf32>
    %378 = arith.addf %374, %377 : vector<8x128xf32>
    %c0_151 = arith.constant 0 : index
    %c0_152 = arith.constant 0 : index
    %379 = vector.load %arg18[%c0_151, %c0_152] : memref<128x20xbf16, #tpu.memory_space<vmem>>, vector<128x20xbf16>
    %380 = arith.truncf %378 : vector<8x128xf32> to vector<8x128xbf16>
    %cst_153 = arith.constant dense<0.000000e+00> : vector<8x20xf32>
    %381 = tpu.matmul %380, %379, %cst_153 {dimension_numbers = #tpu.dot_dimension_numbers<[1], [0], [0], [1], [0, 0, 1, 1], [], []>} : vector<8x128xbf16>, vector<128x20xbf16>, vector<8x20xf32> -> vector<8x20xf32>
    %c0_154 = arith.constant 0 : index
    %c0_155 = arith.constant 0 : index
    %382 = vector.load %arg19[%c0_154, %c0_155] : memref<1x20xf32, #tpu.memory_space<vmem>>, vector<1x20xf32>
    %383 = vector.broadcast %382 : vector<1x20xf32> to vector<8x20xf32>
    %384 = arith.addf %381, %383 : vector<8x20xf32>
    %385 = vector.shape_cast %384 : vector<8x20xf32> to vector<1x8x20xf32>
    %c0_156 = arith.constant 0 : index
    %c0_157 = arith.constant 0 : index
    %c0_158 = arith.constant 0 : index
    %386 = vector.load %arg20[%c0_156, %c0_157, %c0_158] : memref<1x8x20xf32, #tpu.memory_space<vmem>>, vector<1x8x20xf32>
    tpu.vector_store %arg20[%c0_156, %c0_157, %c0_158], %385 {strides = array<i32>} : memref<1x8x20xf32, #tpu.memory_space<vmem>>, vector<1x8x20xf32>,
    return
  }
  func.func @transform_0(%arg0: i32) -> (i32, i32, i32) {
    %c1_i32 = arith.constant 1 : i32
    %c0_i32 = arith.constant 0 : i32
    %c0_i32_0 = arith.constant 0 : i32
    return %arg0, %c1_i32, %c0_i32 : i32, i32, i32
  }
  func.func @transform_1(%arg0: i32) -> (i32, i32) {
    %c0_i32 = arith.constant 0 : i32
    %c0_i32_0 = arith.constant 0 : i32
    %c0_i32_1 = arith.constant 0 : i32
    return %c0_i32, %c0_i32_0 : i32, i32
  }
  func.func @transform_2(%arg0: i32) -> (i32, i32) {
    %c0_i32 = arith.constant 0 : i32
    %c0_i32_0 = arith.constant 0 : i32
    %c0_i32_1 = arith.constant 0 : i32
    return %c0_i32, %c0_i32_0 : i32, i32
  }
  func.func @transform_3(%arg0: i32) -> (i32, i32) {
    %c0_i32 = arith.constant 0 : i32
    %c0_i32_0 = arith.constant 0 : i32
    %c0_i32_1 = arith.constant 0 : i32
    return %c0_i32, %c0_i32_0 : i32, i32
  }
  func.func @transform_4(%arg0: i32) -> (i32, i32) {
    %c0_i32 = arith.constant 0 : i32
    %c0_i32_0 = arith.constant 0 : i32
    %c0_i32_1 = arith.constant 0 : i32
    return %c0_i32, %c0_i32_0 : i32, i32
  }
  func.func @transform_5(%arg0: i32) -> (i32, i32, i32) {
    %c0_i32 = arith.constant 0 : i32
    %c0_i32_0 = arith.constant 0 : i32
    %c0_i32_1 = arith.constant 0 : i32
    %c0_i32_2 = arith.constant 0 : i32
    return %c0_i32, %c0_i32_0, %c0_i32_1 : i32, i32, i32
  }
  func.func @transform_6(%arg0: i32) -> (i32, i32, i32) {
    %c0_i32 = arith.constant 0 : i32
    %c0_i32_0 = arith.constant 0 : i32
    %c0_i32_1 = arith.constant 0 : i32
    %c0_i32_2 = arith.constant 0 : i32
    return %c0_i32, %c0_i32_0, %c0_i32_1 : i32, i32, i32
  }
  func.func @transform_7(%arg0: i32) -> (i32, i32, i32) {
    %c0_i32 = arith.constant 0 : i32
    %c0_i32_0 = arith.constant 0 : i32
    %c0_i32_1 = arith.constant 0 : i32
    %c0_i32_2 = arith.constant 0 : i32
    return %c0_i32, %c0_i32_0, %c0_i32_1 : i32, i32, i32
  }
  func.func @transform_8(%arg0: i32) -> (i32, i32, i32) {
    %c0_i32 = arith.constant 0 : i32
    %c0_i32_0 = arith.constant 0 : i32
    %c0_i32_1 = arith.constant 0 : i32
    %c0_i32_2 = arith.constant 0 : i32
    return %c0_i32, %c0_i32_0, %c0_i32_1 : i32, i32, i32
  }
  func.func @transform_9(%arg0: i32) -> (i32, i32, i32) {
    %c0_i32 = arith.constant 0 : i32
    %c0_i32_0 = arith.constant 0 : i32
    %c0_i32_1 = arith.constant 0 : i32
    %c0_i32_2 = arith.constant 0 : i32
    return %c0_i32, %c0_i32_0, %c0_i32_1 : i32, i32, i32
  }
  func.func @transform_10(%arg0: i32) -> (i32, i32, i32) {
    %c0_i32 = arith.constant 0 : i32
    %c0_i32_0 = arith.constant 0 : i32
    %c0_i32_1 = arith.constant 0 : i32
    %c0_i32_2 = arith.constant 0 : i32
    return %c0_i32, %c0_i32_0, %c0_i32_1 : i32, i32, i32
  }
  func.func @transform_11(%arg0: i32) -> (i32, i32, i32) {
    %c0_i32 = arith.constant 0 : i32
    %c0_i32_0 = arith.constant 0 : i32
    %c0_i32_1 = arith.constant 0 : i32
    %c0_i32_2 = arith.constant 0 : i32
    return %c0_i32, %c0_i32_0, %c0_i32_1 : i32, i32, i32
  }
  func.func @transform_12(%arg0: i32) -> (i32, i32, i32) {
    %c0_i32 = arith.constant 0 : i32
    %c0_i32_0 = arith.constant 0 : i32
    %c0_i32_1 = arith.constant 0 : i32
    %c0_i32_2 = arith.constant 0 : i32
    return %c0_i32, %c0_i32_0, %c0_i32_1 : i32, i32, i32
  }
  func.func @transform_13(%arg0: i32) -> (i32, i32, i32) {
    %c0_i32 = arith.constant 0 : i32
    %c0_i32_0 = arith.constant 0 : i32
    %c0_i32_1 = arith.constant 0 : i32
    %c0_i32_2 = arith.constant 0 : i32
    return %c0_i32, %c0_i32_0, %c0_i32_1 : i32, i32, i32
  }
  func.func @transform_14(%arg0: i32) -> (i32, i32, i32) {
    %c0_i32 = arith.constant 0 : i32
    %c0_i32_0 = arith.constant 0 : i32
    %c0_i32_1 = arith.constant 0 : i32
    %c0_i32_2 = arith.constant 0 : i32
    return %c0_i32, %c0_i32_0, %c0_i32_1 : i32, i32, i32
  }
  func.func @transform_15(%arg0: i32) -> (i32, i32, i32) {
    %c0_i32 = arith.constant 0 : i32
    %c0_i32_0 = arith.constant 0 : i32
    %c0_i32_1 = arith.constant 0 : i32
    %c0_i32_2 = arith.constant 0 : i32
    return %c0_i32, %c0_i32_0, %c0_i32_1 : i32, i32, i32
  }
  func.func @transform_16(%arg0: i32) -> (i32, i32, i32) {
    %c0_i32 = arith.constant 0 : i32
    %c0_i32_0 = arith.constant 0 : i32
    %c0_i32_1 = arith.constant 0 : i32
    %c0_i32_2 = arith.constant 0 : i32
    return %c0_i32, %c0_i32_0, %c0_i32_1 : i32, i32, i32
  }
  func.func @transform_17(%arg0: i32) -> (i32, i32) {
    %c0_i32 = arith.constant 0 : i32
    %c0_i32_0 = arith.constant 0 : i32
    %c0_i32_1 = arith.constant 0 : i32
    return %c0_i32, %c0_i32_0 : i32, i32
  }
  func.func @transform_18(%arg0: i32) -> (i32, i32) {
    %c0_i32 = arith.constant 0 : i32
    %c0_i32_0 = arith.constant 0 : i32
    %c0_i32_1 = arith.constant 0 : i32
    return %c0_i32, %c0_i32_0 : i32, i32
  }
  func.func @transform_19(%arg0: i32) -> (i32, i32, i32) {
    %c0_i32 = arith.constant 0 : i32
    %c0_i32_0 = arith.constant 0 : i32
    %c0_i32_1 = arith.constant 0 : i32
    return %arg0, %c0_i32, %c0_i32_0 : i32, i32, i32
  }
}

</mosaic_0001>

<bundles_post_ra>
// kernel: eeg_transformer_forward.1
= control target key start
LH: loop header
LB: loop body
LE: loop exit
PB: predicated region body
PF: predicated region fallthrough
CT: control target
= control target key end

     0   :  { %s5447_s0 = inlined_call_operand.vmem [shape: f32[2,16,20], index: 0, kind: input, shape index: {}]   ;;  %s5448_s1 = inlined_call_operand.vmem [shape: bf16[20,128], index: 1, kind: input, shape index: {}]   ;;  %s5449_s2 = inlined_call_operand.vmem [shape: f32[8,128], index: 2, kind: input, shape index: {}]   ;;  %s5450_s3 = inlined_call_operand.vmem [shape: f32[1,128], index: 3, kind: input, shape index: {}]   ;;  %s5451_s4 = inlined_call_operand.vmem [shape: f32[1,128], index: 4, kind: input, shape index: {}]   ;;  %s5452_s5 = inlined_call_operand.hbm [shape: bf16[2,128,384], index: 5, kind: input, shape index: {}]   ;;  %s5453_s6 = inlined_call_operand.vmem [shape: f32[2,1,384], index: 6, kind: input, shape index: {}]   ;;  %s5454_s7 = inlined_call_operand.hbm [shape: bf16[2,128,128], index: 7, kind: input, shape index: {}]   ;;  %s5455_s8 = inlined_call_operand.vmem [shape: f32[2,1,128], index: 8, kind: input, shape index: {}]   ;;  %s5456_s9 = inlined_call_operand.vmem [shape: f32[2,1,128], index: 9, kind: input, shape index: {}]   ;;  %s5457_s10 = inlined_call_operand.vmem [shape: f32[2,1,128], index: 10, kind: input, shape index: {}]   ;;  %s5458_s11 = inlined_call_operand.vmem [shape: f32[2,1,128], index: 11, kind: input, shape index: {}]   ;;  %s5459_s12 = inlined_call_operand.vmem [shape: f32[2,1,128], index: 12, kind: input, shape index: {}]   ;;  %s5460_s13 = inlined_call_operand.hbm [shape: bf16[2,128,256], index: 13, kind: input, shape index: {}]   ;;  %s5461_s14 = inlined_call_operand.vmem [shape: f32[2,1,256], index: 14, kind: input, shape index: {}]   ;;  %s5462_s15 = inlined_call_operand.hbm [shape: bf16[2,256,128], index: 15, kind: input, shape index: {}]   ;;  %s5463_s16 = inlined_call_operand.vmem [shape: f32[2,1,128], index: 16, kind: input, shape index: {}]   ;;  %s5464_s17 = inlined_call_operand.vmem [shape: bf16[128,20], index: 17, kind: input, shape index: {}]   ;;  %s5465_s18 = inlined_call_operand.vmem [shape: f32[1,20], index: 18, kind: input, shape index: {}]   ;;  %s5466_s19 = inlined_call_operand.hbm [shape: f32[2,8,20], index: 19, kind: output, shape index: {}]  }
   0x1   :  { %5483 = sst [smem:[#allocation23_spill]] %s5447_s0 }
   0x2   :  { %5484 = sst [smem:[#allocation24_spill]] %s5448_s1 }
   0x3   :  { %5485 = sst [smem:[#allocation25_spill]] %s5449_s2 }
   0x4   :  { %5486 = sst [smem:[#allocation26_spill]] %s5450_s3 }
   0x5   :  { %5487 = sst [smem:[#allocation27_spill]] %s5454_s7 }
   0x6   :  { %5488 = sst [smem:[#allocation28_spill]] %s5465_s18 }
   0x7   :  { %5489 = sst [smem:[#allocation29_spill]] %s5466_s19 }
   0x8   :  { %24 = vsyncpa [#allocation3], 0 }
   0x9   :  { %25 = vsyncpa [#allocation6], 0 }
   0xa   :  { %26 = vsyncpa [#allocation9], 0 }
   0xb   :  { %27 = vsyncpa [#allocation4], 0 }
   0xc   :  { %29 = vsyncpa [#allocation4 + $0x1], 0  ;;  %s4914_s0 = smov 0   ;;  %s4916_s30 = smov 0  }
   0xd   :  { %s4918_s20 = smov 0   ;;  %s4920_s21 = smov 0  }
   0xe LB: > { %5490 = sst [smem:[#allocation15_spill]] %s4786_s0  ;;  %s4935_s1 = sadd.s32 4294967295, %s4798_s21   ;;  %s4798_s21 = sphi %s4920_s21, %s5526_s21   ;;  %s4794_s20 = sphi %s4918_s20, %s5529_s20   ;;  %s4790_s30 = sphi %s4916_s30, %s5528_s30   ;;  %s4786_s0 = sphi %s4914_s0, %s5527_s0  }
   0xf   : > { %5491 = sst [smem:[#allocation16_spill]] %s4790_s30  ;;  %s3792_s22 = sadd.s32 4294967294, %s4798_s21  }
  0x10   : > { %5492 = sst [smem:[#allocation17_spill]] %s4794_s20  ;;  %s4939_s2 = sadd.s32 1, %s4798_s21  }
  0x11   : > { %5493 = sst [smem:[#allocation18_spill]] %s4798_s21  ;;  %s446_s23 = sadd.s32 1, %s4794_s20 }
  0x12   : > { %5494 = sst [smem:[#allocation19_spill]] %s4939_s2  ;;  %s443_s24 = ssub.s32 %s4798_s21, %s4939_s2 }
  0x13   : > { %p456_p0 = scmp.ne.s32.totalorder %s4794_s20, %s4790_s30  ;;  %p444_p1 = scmp.eq.s32.totalorder %s443_s24, 0 }
  0x14   : > { %p457_p2 = scmp.eq.s32.totalorder %s4935_s1, 1  ;;  %p462_p3 = scmp.ne.s32.totalorder %s4790_s30, %s4786_s0 }
  0x15   : > { %p463_p4 = scmp.eq.s32.totalorder %s3792_s22, 1  ;;  %p3793_p7 = scmp.ge.s32.totalorder %s4798_s21, 1 }
  0x16   : > { %s4950_s25 = scalar_select %p444_p1, %s4794_s20, %s446_s23  }
  0x17   : > { %p4952_p5 = por %p457_p2, %p456_p0  ;;  %p4956_p6 = por %p463_p4, %p462_p3 }
  0x18   : > { %5495 = sst [smem:[#allocation20_spill]] %s4950_s25  ;;  %p470_p8 = scmp.lt.s32.totalorder %s4798_s21, 3 }
  0x19   : > { %s5496_s3 = scalar_select %p4952_p5, 1, 0 }
  0x1a   : > { %s5498_s26 = scalar_select %p4956_p6, 1, 0 }
  0x1b   : > { %5497 = sst [smem:[#allocation21_spill]] %s5496_s3  ;;  %p5474_p9 = scmp.eq.s32.totalorder %s4935_s1, 0 }
  0x1c   : > { %5499 = sst [smem:[#allocation22_spill]] %s5498_s26  ;;  %p4963_p10 = pnand %p3793_p7, %p470_p8 }
  0x1d   : > { %s4800_s28 = smov [#allocation5]   ;;  %s4801_s23 = smov [#allocation2]  }
  0x1e   : > { %s5500_s27 = scalar_select %p4963_p10, 1, 0 }
  0x1f   : > { %s510_s29 = sshll.u32 %s4800_s28, 4  ;;  %p4329_p11 = pneg %p4963_p10  ;;  %s511_s29 = int_to_ptr.vmem [resolvable:$true] %s510_s29 }
  0x20   : > { %s494_s24 = sshll.u32 %s4801_s23, 4  ;;  %s5502_s7 = sld [smem:[#allocation27_spill]]  ;;  %s4975_s24 = int_to_ptr.vmem [resolvable:$true] %s494_s24 }
  0x21   : > { %p4971_p12 = pnand %p5474_p9, %p4329_p11 }
  0x23   : > { %p4985_p0 = pneg %p4971_p12 }
  0x26   : > { %s4612_s2 = scalar_lea.hbm %s5502_s7, 2048 }
  0x27   : > { %p4613_p13 = scmp.ne.s32.totalorder %s5502_s7, %s4612_s2  ;;  %p4619_p3 = scmp.lt.u32.totalorder %s4612_s2, %s5502_s7 }
  0x29   : > { %p4615_p1 = pnand %p4985_p0, %p4613_p13 }
  0x2b   : > { %p4616_p2 = pneg %p4615_p1 }
  0x2d   : > { %p4621_p4 = pnand %p4619_p3, %p4616_p2 }
  0x2f   : > { %4624 = shalt.err (!%p4621_p4)
}
  0x30   : > { %s4625_s20 = scalar_lea.vmem %s511_s29, 2048  ;;  %p4633_p9 = scmp.lt.s32.totalorder %s511_s29, %s511_s29 }
  0x31   : > { %p4626_p7 = scmp.ne.s32.totalorder %s511_s29, %s4625_s20  ;;  %p4634_p6 = scmp.lt.s32.totalorder %s4625_s20, %s4625_s20 }
  0x33   : > { %p4628_p8 = pnand %p4626_p7, %p4985_p0  ;;  %p4635_p5 = por %p4634_p6, %p4633_p9 }
  0x35   : > { %p4629_p11 = pneg %p4628_p8 }
  0x37   : > { %p4636_p10 = pnand %p4635_p5, %p4629_p11 }
  0x39   : > { %4639 = shalt.err (!%p4636_p10)
}
  0x3a   : > { %s5481_s0 = smov 64   ;;  %s5482_s25 = smov 4  }
  0x3b   : > { %4335 = dma.hbm_to_vmem [thread:$0]  (!%p4971_p12), %s5502_s7, 2048, %s511_s29, [#allocation6], %s5481_s0, %s5481_s0, %s5482_s25  }
  0x3c   : > { %s4640_s19 = scalar_lea.hbm %s5452_s5, 6144 }
  0x3d   : > { %p4641_p5 = scmp.ne.s32.totalorder %s5452_s5, %s4640_s19  ;;  %p4647_p10 = scmp.lt.u32.totalorder %s4640_s19, %s5452_s5 }
  0x3f   : > { %p4643_p6 = pnand %p4641_p5, %p4985_p0 }
  0x41   : > { %p4644_p9 = pneg %p4643_p6 }
  0x43   : > { %p4649_p13 = pnand %p4647_p10, %p4644_p9 }
  0x45   : > { %4652 = shalt.err (!%p4649_p13)
}
  0x46   : > { %s4653_s29 = scalar_lea.vmem %s4975_s24, 6144  ;;  %p4661_p4 = scmp.lt.s32.totalorder %s4975_s24, %s4975_s24 }
  0x47   : > { %p4654_p1 = scmp.ne.s32.totalorder %s4975_s24, %s4653_s29  ;;  %p4662_p7 = scmp.lt.s32.totalorder %s4653_s29, %s4653_s29 }
  0x49   : > { %p4656_p2 = pnand %p4654_p1, %p4985_p0  ;;  %p4663_p8 = por %p4662_p7, %p4661_p4 }
  0x4b   : > { %p4657_p3 = pneg %p4656_p2 }
  0x4d   : > { %p4664_p11 = pnand %p4663_p8, %p4657_p3 }
  0x4f   : > { %4667 = shalt.err (!%p4664_p11)
}
  0x50   : > { %s4804_s3 = smov 192   ;;  %s4805_s18 = smov 12  }
  0x51   : > { %4332 = dma.hbm_to_vmem [thread:$0]  (!%p4971_p12), %s5452_s5, 6144, %s4975_s24, [#allocation3], %s4804_s3, %s4804_s3, %s4805_s18  }
  0x52   : > { %s4806_s21 = smov [#allocation7]   ;;  %s4668_s20 = scalar_lea.hbm %s5460_s13, 4096 }
  0x53   : > { %s538_s2 = sshll.u32 %s4806_s21, 4  ;;  %p4669_p5 = scmp.ne.s32.totalorder %s5460_s13, %s4668_s20  ;;  %s539_s2 = int_to_ptr.vmem [resolvable:$true] %s538_s2 }
  0x54   : > { %p4675_p10 = scmp.lt.u32.totalorder %s4668_s20, %s5460_s13 }
  0x55   : > { %p4671_p6 = pnand %p4669_p5, %p4985_p0 }
  0x57   : > { %p4672_p9 = pneg %p4671_p6 }
  0x59   : > { %p4677_p13 = pnand %p4675_p10, %p4672_p9 }
  0x5b   : > { %4680 = shalt.err (!%p4677_p13)
}
  0x5c   : > { %s4681_s24 = scalar_lea.vmem %s539_s2, 4096  ;;  %p4689_p4 = scmp.lt.s32.totalorder %s539_s2, %s539_s2 }
  0x5d   : > { %p4682_p1 = scmp.ne.s32.totalorder %s539_s2, %s4681_s24  ;;  %p4690_p7 = scmp.lt.s32.totalorder %s4681_s24, %s4681_s24 }
  0x5f   : > { %p4684_p2 = pnand %p4682_p1, %p4985_p0  ;;  %p4691_p8 = por %p4690_p7, %p4689_p4 }
  0x61   : > { %p4685_p3 = pneg %p4684_p2 }
  0x63   : > { %p4692_p11 = pnand %p4691_p8, %p4685_p3 }
  0x65   : > { %4695 = shalt.err (!%p4692_p11)
}
  0x66   : > { %s4807_s0 = smov 128   ;;  %s4808_s3 = smov 8  }
  0x67   : > { %4338 = dma.hbm_to_vmem [thread:$0]  (!%p4971_p12), %s5460_s13, 4096, %s539_s2, [#allocation6], %s4807_s0, %s4807_s0, %s4808_s3  }
  0x68   : > { %s4809_s18 = smov [#allocation8]   ;;  %s4696_s26 = scalar_lea.hbm %s5462_s15, 4096 }
  0x69   : > { %s554_s19 = sshll.u32 %s4809_s18, 4  ;;  %p4697_p5 = scmp.ne.s32.totalorder %s5462_s15, %s4696_s26  ;;  %s555_s19 = int_to_ptr.vmem [resolvable:$true] %s554_s19 }
  0x6a   : > { %p4703_p10 = scmp.lt.u32.totalorder %s4696_s26, %s5462_s15 }
  0x6b   : > { %p4699_p6 = pnand %p4697_p5, %p4985_p0 }
  0x6d   : > { %p4700_p9 = pneg %p4699_p6 }
  0x6f   : > { %p4705_p13 = pnand %p4703_p10, %p4700_p9 }
  0x71   : > { %4708 = shalt.err (!%p4705_p13)
}
  0x72   : > { %s4709_s2 = scalar_lea.vmem %s555_s19, 4096  ;;  %p4717_p4 = scmp.lt.s32.totalorder %s555_s19, %s555_s19 }
  0x73   : > { %p4710_p1 = scmp.ne.s32.totalorder %s555_s19, %s4709_s2  ;;  %p4718_p7 = scmp.lt.s32.totalorder %s4709_s2, %s4709_s2 }
  0x75   : > { %p4712_p2 = pnand %p4710_p1, %p4985_p0  ;;  %p4719_p8 = por %p4718_p7, %p4717_p4 }
  0x77   : > { %p4713_p3 = pneg %p4712_p2 }
  0x79   : > { %p4720_p11 = pnand %p4719_p8, %p4713_p3 }
  0x7b   : > { %4723 = shalt.err (!%p4720_p11)
}
  0x7c   : > { %s5504_s0 = smov 4   ;;  %s5505_s3 = smov 64  }
  0x7d   : > { %4341 = dma.hbm_to_vmem [thread:$0]  (!%p4971_p12), %s5462_s15, 4096, %s555_s19, [#allocation9], %s5505_s3, %s5505_s3, %s5504_s0  }
  0x7e   : > { %p5506_p5 = scmp.ne.s32.totalorder %s5500_s27, 0 }
  0x7f   : > { %p5507_p0 = scmp.eq.s32.totalorder (!%p5506_p5), %s4935_s1, 0 }
  0x80   : > { %588 = sbr.rel (%p5506_p5) target bundleno = 6494 (0x195e), region = 96 }
  0x87   : > { %4769 = dma.done.wait (%p5507_p0), [#allocation3], 6144   ;;  %p5508_p6 = pmov %p5507_p0 }
  0x88   : > { %p5509_p9 = pmov %p5507_p0 }
  0x89   : > { %4771 = vsyncadd (%p5508_p6), [#allocation3], 4294961152 }
  0x8a   : > { %4773 = dma.done.wait (%p5509_p9), [#allocation6], 6144   ;;  %p5510_p10 = pmov %p5507_p0 }
  0x8b   : > { %p5511_p13 = pmov %p5507_p0 }
  0x8c   : > { %4775 = vsyncadd (%p5510_p10), [#allocation6], 4294961152 }
  0x8d   : > { %4777 = dma.done.wait (%p5511_p13), [#allocation9], 4096   ;;  %p5512_p12 = pmov %p5507_p0 }
  0x8e   : > { %p657_p1 = scmp.lt.s32.totalorder %s4935_s1, 1  ;;  %v4810_v0 = vmov 0.0   ;;  %vm4811_vm0 = vmmov 0   ;;  %s5513_s19 = sld [smem:[#allocation23_spill]]  ;;  %vm682_vm1 = vcmask 1041408   ;;  %vm678_vm2 = vcmask 162816  }
  0x8f   : > { %4779 = vsyncadd (%p5512_p12), [#allocation9], 4294963200  ;;  %4111 = vmatprep.subr.bf16.mxu1 %v4810_v0  ;;  %4115 = vmatprep.mubr.msk.bf16.mxu1 %vm4811_vm0, %v4810_v0  ;;  %s5514_s23 = sld [smem:[#allocation24_spill]]  ;;  %s5515_s0 = sld [smem:[#allocation25_spill]]  ;;  %v3812_v22 = vld [vmem:[%s5451_s4] ss:$0 sm:$0xff] }
  0x90   : > { %s658_s27 = scalar_select %p657_p1, %s4935_s1, 1  ;;  %4119 = vmatprep.subr.bf16.mxu0 %v4810_v0  ;;  %4135 = vmatprep.mubr.msk.bf16.mxu0 %vm4811_vm0, %v4810_v0  ;;  %v4402_v25 = vld [vmem:[#allocation2] ss:$12 sps:$4 sm:$0xff]   ;;  %v4404_v26 = vld [vmem:[#allocation2 + $0x4] ss:$12 sps:$4 sm:$0xff]   ;;  %v4812_v48 = vmov 0  }
  0x91   : > { %s5516_s25 = sld [smem:[#allocation26_spill]]  ;;  %v4405_v27 = vld [vmem:[#allocation2 + $0x8] ss:$12 sps:$4 sm:$0xff]   ;;  %v4409_v29 = vld [vmem:[#allocation2 + $0x20] ss:$12 sps:$4 sm:$0xff]   ;;  %vm1135_vm11 = vcmask 64512  }
  0x92   : > { %s3986_s22 = sshll.u32 %s658_s27, 4  ;;  %v4408_v28 = vld [vmem:[#allocation2 + $0x1c] ss:$12 sps:$4 sm:$0xff]   ;;  %4120 = vmatpush3.bf16.msra.mxu0 %v4405_v27  ;;  %v4406_v30 = vld [vmem:[#allocation2 + $0x18] ss:$12 sps:$4 sm:$0xff]   ;;  %s5517_s7 = sld [smem:[#allocation16_spill]] }
  0x93   : > { %4121 = vmatprep.subr.bf16.mxu0 %v4810_v0  ;;  %v4412_v31 = vld [vmem:[#allocation2 + $0x34] ss:$12 sps:$4 sm:$0xff]   ;;  %v4410_v32 = vld [vmem:[#allocation2 + $0x30] ss:$12 sps:$4 sm:$0xff]   ;;  %v4413_v37 = vld [vmem:[#allocation2 + $0x38] ss:$12 sps:$4 sm:$0xff]  }
  0x94   : > { %s3725_s30 = scalar_lea.vmem %s5513_s19, %s3986_s22  ;;  %v4416_v38 = vld [vmem:[#allocation2 + $0x4c] ss:$12 sps:$4 sm:$0xff]   ;;  %v4414_v39 = vld [vmem:[#allocation2 + $0x48] ss:$12 sps:$4 sm:$0xff]   ;;  %v4417_v40 = vld [vmem:[#allocation2 + $0x50] ss:$12 sps:$4 sm:$0xff]  }
  0x95   : > { %v4400_v1 = vld [vmem:[%s5514_s23] sm:$0xff]   ;;  %v4401_v2 = vld [vmem:[%s5514_s23 + $0x8] ss:$0 sps:$4 sm:$0x33]   ;;  %v4426_v49 = vld [vmem:[#allocation2 + $0x90] ss:$12 sps:$4 sm:$0xff]  }
  0x96   : > { %v3807_v3 = vld [vmem:[%s3725_s30 + $0x8] sm:$0xff]  ;;  %4112 = vmatpush3.bf16.msra.mxu1 %v4400_v1  ;;  %v684_v4 = vsel %vm682_vm1, %v4401_v2, 0  ;;  %v726_v6 = vld [vmem:[%s5515_s0] sm:$0xff]  ;;  %4122 = vmatpush3.bf16.msra.mxu0 %v4409_v29  ;;  %v4433_v53 = vld [vmem:[#allocation2 + $0xb0] ss:$12 sps:$4 sm:$0xff]   ;;  %v756_v1 = vlaneseq  ;;  %s5518_s26 = sld [smem:[#allocation28_spill]] }
  0x97   : > { %4113 = vmatprep.subr.bf16.mxu1 %v4810_v0  ;;  %v668_v5 = vpack.c.bf16 %v3807_v3, %v3807_v3  ;;  %v3811_v20 = vld [vmem:[%s5516_s25] ss:$0 sm:$0xff]  ;;  %4123 = vmatprep.subr.bf16.mxu0 %v4810_v0  ;;  %v4420_v42 = vld [vmem:[#allocation2 + $0x64] ss:$12 sps:$4 sm:$0xff]   ;;  %v4421_v43 = vld [vmem:[#allocation2 + $0x68] ss:$12 sps:$4 sm:$0xff]  }
  0x98   : > { %v4418_v41 = vld [vmem:[#allocation2 + $0x60] ss:$12 sps:$4 sm:$0xff]   ;;  %v4424_v44 = vld [vmem:[#allocation2 + $0x7c] ss:$12 sps:$4 sm:$0xff]   ;;  %v4422_v45 = vld [vmem:[#allocation2 + $0x78] ss:$12 sps:$4 sm:$0xff]  }
  0x99   : > { %v4425_v46 = vld [vmem:[#allocation2 + $0x80] ss:$12 sps:$4 sm:$0xff]   ;;  %v4429_v50 = vld [vmem:[#allocation2 + $0x98] ss:$12 sps:$4 sm:$0xff]   ;;  %v4430_v52 = vld [vmem:[#allocation2 + $0xa8] ss:$12 sps:$4 sm:$0xff]  }
  0x9a   : > { %4114 = vmatpush3.bf16.msra.mxu1 %v684_v4  ;;  %4124 = vmatpush3.bf16.msra.mxu0 %v4413_v37  ;;  %v4428_v47 = vld [vmem:[#allocation2 + $0x94] ss:$12 sps:$4 sm:$0xff]   ;;  %v4432_v51 = vld [vmem:[#allocation2 + $0xac] ss:$12 sps:$4 sm:$0xff]   ;;  %v5132_v2 = vshrl.u32 %v756_v1, 7  ;;  %v757_v3 = vand.u32 127, %v756_v1 }
  0x9b   : > { %983 = vmatprep.subr.bf16.mxu1 %v4404_v26  ;;  %4125 = vmatprep.subr.bf16.mxu0 %v4810_v0  ;;  %v3817_v58 = vld [vmem:[%s5456_s9] ss:$0 sm:$0xff]  ;;  %s654_s18 = sand.u32 1, %s5517_s7   ;;  %s5519_s20 = sld [smem:[#allocation21_spill]] }
  0x9c   : > { %v3818_v60 = vld [vmem:[%s5457_s10] ss:$0 sm:$0xff]  ;;  %v850_v4 = vsub.s32 2, %v5132_v2  ;;  %vm763_vm3 = vcmp.ge.s32.totalorder %v757_v3, 32  ;;  %vm764_vm4 = vcmp.lt.s32.totalorder %v757_v3, 64  ;;  %vm759_vm6 = vcmp.lt.s32.totalorder %v757_v3, 32 }
  0x9d   : > { %4116 = vmatmul.mubr.msk.bf16.vlgmr.msra.gmra.mrb[0].mxu1 %vm678_vm2, %v668_v5  ;;  %v838_v5 = vld [vmem:[%s5453_s6] sm:$0x7]  ;;  %vm765_vm5 = vmand %vm763_vm3, %vm764_vm4  ;;  %vm768_vm7 = vcmp.ge.s32.totalorder %v757_v3, 64  ;;  %vm769_vm8 = vcmp.lt.s32.totalorder %v757_v3, 96  ;;  %vm773_vm10 = vcmp.ge.s32.totalorder %v757_v3, 96  ;;  %s3804_s19 = sshll.u32 %s654_s18, 3 }
  0x9e   : > { %984 = vmatpush1.bf16.msra.mxu1 %v4402_v25  ;;  %4126 = vmatpush3.bf16.msra.mxu0 %v4417_v40  ;;  %vm770_vm9 = vmand %vm768_vm7, %vm769_vm8  ;;  %v4434_v3 = vld [vmem:[#allocation5] sm:$0xff]   ;;  %s3983_s29 = sshll.u32 %s4935_s1, 7  ;;  %s656_s24 = scalar_lea.vmem [#allocation10], %s3804_s19 }
  0x9f   : > { %985 = vmatprep.subr.bf16.mxu1 %v4408_v28  ;;  %4127 = vmatprep.subr.bf16.mxu0 %v4810_v0  ;;  %v5163_v28 = vsel %vm770_vm9, 1.0, %v4810_v0  ;;  %s3686_s2 = sshll.u32 %s656_s24, 4  ;;  %s5520_s25 = sld [smem:[#allocation29_spill]]  ;;  %s5406_s2 = int_to_ptr.vmem [resolvable:$true] %s3686_s2 }
  0xa0   : > { %1015 = vmatprep.mubr.bf16.mxu1 %v4812_v48  ;;  %s3673_s1 = scalar_lea.sflag [#allocation4], %s654_s18  ;;  %s4724_s7 = scalar_lea.vmem %s5406_s2, 128 }
  0xa1   : > { %p4725_p2 = scmp.ne.s32.totalorder %s5406_s2, %s4724_s7  ;;  %p5521_p3 = scmp.ne.s32.totalorder %s5519_s20, 0 }
  0xa2   : > { %986 = vmatpush1.bf16.msra.mxu1 %v4406_v30  ;;  %4128 = vmatpush3.bf16.msra.mxu0 %v4421_v43  ;;  %v5170_v30 = vsel %vm773_vm10, 1.0, %v4810_v0  ;;  %s4813_s22 = smov [#allocation10]  }
  0xa3   : > { %987 = vmatprep.subr.bf16.mxu1 %v4412_v31  ;;  %4129 = vmatprep.subr.bf16.mxu0 %v4810_v0  ;;  %p4726_p4 = pnand %p4725_p2, %p5521_p3  ;;  %s4728_s28 = sshll.u32 %s4813_s22, 4  ;;  %s4729_s28 = int_to_ptr.vmem [resolvable:$false] %s4728_s28 }
  0xa4   : > { %s4730_s19 = scalar_lea.vmem %s4729_s28, 256  ;;  %p4731_p8 = scmp.lt.s32.totalorder %s5406_s2, %s4729_s28 }
  0xa5   : > { %s5404_s27 = scalar_lea.hbm %s5520_s25, %s3983_s29  ;;  %p4727_p7 = pneg %p4726_p4 }
  0xa6   : > { %988 = vmatpush1.bf16.msra.mxu1 %v4410_v32  ;;  %4130 = vmatpush3.bf16.msra.mxu0 %v4425_v46  ;;  %p4732_p11 = scmp.lt.s32.totalorder %s4730_s19, %s4724_s7 }
  0xa7   : > { %989 = vmatprep.subr.bf16.mxu1 %v4416_v38  ;;  %4131 = vmatprep.subr.bf16.mxu0 %v4810_v0 }
  0xa8   : > { %p4733_p5 = por %p4732_p11, %p4731_p8 }
  0xaa   : > { %990 = vmatpush1.bf16.msra.mxu1 %v4414_v39  ;;  %4132 = vmatpush3.bf16.msra.mxu0 %v4429_v50  ;;  %p4734_p0 = pnand %p4733_p5, %p4727_p7 }
  0xab   : > { %991 = vmatprep.subr.bf16.mxu1 %v4420_v42  ;;  %4133 = vmatprep.subr.bf16.mxu0 %v4810_v0 }
  0xae   : > { %992 = vmatpush1.bf16.msra.mxu1 %v4418_v41  ;;  %4134 = vmatpush3.bf16.msra.mxu0 %v4433_v53 }
  0xaf   : > { %993 = vmatprep.subr.bf16.mxu1 %v4424_v44  ;;  %4149 = vmatprep.subr.mxu0 %v4810_v0 }
  0xb2   : > { %994 = vmatpush1.bf16.msra.mxu1 %v4422_v45 }
  0xb3   : > { %995 = vmatprep.subr.bf16.mxu1 %v4428_v47 }
  0xb6   : > { %996 = vmatpush1.bf16.msra.mxu1 %v4426_v49 }
  0xb7   : > { %997 = vmatprep.subr.bf16.mxu1 %v4432_v51 }
  0xba   : > { %998 = vmatpush1.bf16.msra.mxu1 %v4430_v52 }
  0xbb   : > { %4139 = vmatprep.subr.mxu1 %v4810_v0 }
 0x170   : > { %v720_v7 = vpop.f32.mrb[0].mxu1 }
 0x171   : > { %v727_v8 = vadd.f32 %v726_v6, %v720_v7  ;;  %v4117_v9 = vpop.f32.mrb[1].mxu1  ;;  %v5139_v6 = vsub.s32 1, %v5132_v2  ;;  %v851_v7 = vrot.slane %v838_v5, %v850_v4 }
 0x172   : > { %v723_v10 = vpop.f32.mrb[2].mxu1  ;;  %v5145_v9 = vsub.s32 0, %v5132_v2 }
 0x173   : > { %730 = vadd.xlane.f32.xlu0 %v727_v8  ;;  %v4118_v11 = vpop.f32.mrb[3].mxu1 }
 0x200   : > { %v731_v12 = vpop.xlane.xlu0 %730 }
 0x201   : > { %v733_v13 = vmul.f32 0.0078125, %v731_v12  ;;  %v5148_v12 = vsel %vm765_vm5, 1.0, %v4810_v0 }
 0x203   : > { %v734_v14 = vsub.f32 %v727_v8, %v733_v13  ;;  %v847_v8 = vrot.slane %v838_v5, %v5139_v6 }
 0x205   : > { %v735_v15 = vmul.f32 %v734_v14, %v734_v14 }
 0x207   : > { %736 = vadd.xlane.f32.xlu0 %v735_v15 }
 0x294   : > { %v737_v16 = vpop.xlane.xlu0 %736 }
 0x295   : > { %v738_v17 = vmul.f32 0.0078125, %v737_v16  ;;  %v5153_v16 = vsel %vm759_vm6, 1.0, %v4810_v0 }
 0x297   : > { %v739_v18 = vadd.f32 1e-05, %v738_v17 }
 0x299   : > { %4570 = vrsqrt.f32 %v739_v18 }
 0x2a3   : > { %v4571_v19 = vpop.eup %4570 }
 0x2a4   : > { %v741_v21 = vmul.f32 %v4571_v19, %v734_v14 }
 0x2a6   : > { %v748_v23 = vmul.f32 %v3811_v20, %v741_v21  ;;  %v843_v20 = vrot.slane %v838_v5, %v5145_v9  ;;  %v4435_v5 = vld [vmem:[#allocation5 + $0x8] sm:$0xff]  }
 0x2a8   : > { %v5108_v24 = vadd.f32 %v3812_v22, %v748_v23 }
 0x2aa   : > { %780 = vadd.xlane.f32.xlu1 %v5108_v24 }
 0x337   : > { %v781_v33 = vpop.xlane.xlu1 %780 }
 0x338   : > { %v782_v34 = vmul.f32 0.0078125, %v781_v33 }
 0x33a   : > { %v783_v35 = vsub.f32 %v5108_v24, %v782_v34 }
 0x33c   : > { %v784_v36 = vmul.f32 %v783_v35, %v783_v35 }
 0x33e   : > { %785 = vadd.xlane.f32.xlu1 %v784_v36 }
 0x3cb   : > { %v786_v54 = vpop.xlane.xlu1 %785 }
 0x3cc   : > { %v787_v55 = vmul.f32 0.0078125, %v786_v54 }
 0x3ce   : > { %v788_v56 = vadd.f32 1e-05, %v787_v55 }
 0x3d0   : > { %4572 = vrsqrt.f32 %v788_v56 }
 0x3da   : > { %v4573_v57 = vpop.eup %4572 }
 0x3db   : > { %v790_v59 = vmul.f32 %v4573_v57, %v783_v35 }
 0x3dd   : > { %v797_v61 = vmul.f32 %v3817_v58, %v790_v59 }
 0x3df   : > { %v804_v62 = vadd.f32 %v3818_v60, %v797_v61 }
 0x3e1   : > { %v837_v63 = vpack.c.bf16 %v804_v62, %v804_v62 }
 0x3e3   : > { %1016 = vmatmul.mubr.bf16.vlgmr.msra.gmra.mrb[4].mxu1 %v837_v63  ;;  %4136 = vmatmul.mubr.bf16.vlgmr.msra.gmra.mrb[0].mxu0 %v837_v63 }
 0x3e4   : > { %4141 = vmatprep.mubr.msk.f32.mxu1 %vm4811_vm0, %v4810_v0  ;;  %4151 = vmatprep.mubr.msk.f32.mxu0 %vm4811_vm0, %v4810_v0 }
 0x4b6   : > { %v1017_v10 = vpop.f32.mrb[4].mxu1  ;;  %v1058_v11 = vpop.f32.mrb[0].mxu0 }
 0x4b7   : > { %v5150_v13 = vadd.f32 %v1058_v11, %v851_v7  ;;  %v1019_v14 = vpop.f32.mrb[5].mxu1  ;;  %v4137_v15 = vpop.f32.mrb[1].mxu0  ;;  %v1018_v26 = vadd.f32 %v1017_v10, %v843_v20  ;;  %v4436_v7 = vld [vmem:[#allocation5 + $0x10] sm:$0xff]   ;;  %v4438_v10 = vld [vmem:[#allocation5 + $0x20] sm:$0xff]   ;;  %v4439_v11 = vld [vmem:[#allocation5 + $0x28] sm:$0xff]  }
 0x4b8   : > { %v1020_v17 = vadd.f32 %v1019_v14, %v847_v8  ;;  %v1021_v18 = vpop.f32.mrb[6].mxu1  ;;  %v1061_v19 = vpop.f32.mrb[2].mxu0  ;;  %v4437_v8 = vld [vmem:[#allocation5 + $0x18] sm:$0xff]   ;;  %v4440_v14 = vld [vmem:[#allocation5 + $0x30] sm:$0xff]  }
 0x4b9   : > { %v1022_v21 = vpop.f32.mrb[7].mxu1  ;;  %v4138_v22 = vpop.f32.mrb[3].mxu0  ;;  %v1230_v23 = vmul.f32 %v5148_v12, %v5150_v13 }
 0x4ba   : > { %v1064_v25 = vmul.f32 %v5153_v16, %v1020_v17  ;;  %v1148_v27 = vmul.f32 %v5148_v12, %v1020_v17  ;;  %v1377_v29 = vmul.f32 %v5163_v28, %v1020_v17  ;;  %v1534_v31 = vmul.f32 %v5170_v30, %v1020_v17 }
 0x4bb   : > { %4150 = vmatpush3.msra.mxu0 %v1230_v23  ;;  %v1147_v21 = vmul.f32 %v5153_v16, %v5150_v13 }
 0x4bc   : > { %4140 = vmatpush3.xpose.msra.mxu1 %v1064_v25  ;;  %4154 = vmatprep.subr.mxu0 %v4810_v0 }
 0x4bd   : > { %4144 = vmatprep.subr.mxu1 %v4810_v0 }
 0x4bf   : > { %4142 = vmatmul.mubr.f32.vlgmr.msra.gmra.mrb[8].mxu1 %v1018_v26 }
 0x4c0   : > { %4145 = vmatpush3.xpose.msra.mxu1 %v1148_v27  ;;  %4146 = vmatprep.mubr.msk.f32.mxu1 %vm4811_vm0, %v4810_v0 }
 0x4c1   : > { %4159 = vmatprep.subr.mxu1 %v4810_v0 }
 0x4c3   : > { %4147 = vmatmul.mubr.f32.vlgmr.msra.gmra.mrb[10].mxu1 %v1018_v26 }
 0x4c4   : > { %4160 = vmatpush3.xpose.msra.mxu1 %v1377_v29  ;;  %4161 = vmatprep.mubr.msk.f32.mxu1 %vm4811_vm0, %v4810_v0 }
 0x4c5   : > { %4169 = vmatprep.subr.mxu1 %v4810_v0 }
 0x4c7   : > { %4162 = vmatmul.mubr.f32.vlgmr.msra.gmra.mrb[12].mxu1 %v1018_v26 }
 0x4c8   : > { %4170 = vmatpush3.xpose.msra.mxu1 %v1534_v31  ;;  %4171 = vmatprep.mubr.msk.f32.mxu1 %vm4811_vm0, %v4810_v0  ;;  %v1616_v31 = vmul.f32 %v5170_v30, %v5150_v13 }
 0x4c9   : > { %4179 = vmatprep.subr.bf16.mxu1 %v4810_v0 }
 0x4cb   : > { %4172 = vmatmul.mubr.f32.vlgmr.msra.gmra.mrb[14].mxu1 %v1018_v26  ;;  %v1459_v26 = vmul.f32 %v5163_v28, %v5150_v13  ;;  %v3855_v13 = vld [vmem:[%s5455_s8] ss:$0 sm:$0xff] }
 0x4cc   : > { %4195 = vmatprep.mubr.msk.bf16.mxu1 %vm4811_vm0, %v4810_v0  ;;  %4180 = vmatpush3.bf16.msra.mxu1 %v4434_v3  ;;  %v4467_v3 = vld [vmem:[#allocation8] sm:$0xff]  }
 0x4cd   : > { %4181 = vmatprep.subr.bf16.mxu1 %v4810_v0 }
 0x4d0   : > { %4182 = vmatpush3.bf16.msra.mxu1 %v4435_v5  ;;  %v4468_v5 = vld [vmem:[#allocation8 + $0x48] sm:$0xff]  }
 0x4d1   : > { %4183 = vmatprep.subr.bf16.mxu1 %v4810_v0 }
 0x4d4   : > { %4184 = vmatpush3.bf16.msra.mxu1 %v4436_v7  ;;  %v4469_v7 = vld [vmem:[#allocation8 + $0x8] sm:$0xff]  }
 0x4d5   : > { %4185 = vmatprep.subr.bf16.mxu1 %v4810_v0 }
 0x4d8   : > { %4186 = vmatpush3.bf16.msra.mxu1 %v4437_v8  ;;  %v4470_v8 = vld [vmem:[#allocation8 + $0x50] sm:$0xff]  }
 0x4d9   : > { %4187 = vmatprep.subr.bf16.mxu1 %v4810_v0 }
 0x4dc   : > { %4188 = vmatpush3.bf16.msra.mxu1 %v4438_v10  ;;  %v4471_v10 = vld [vmem:[#allocation8 + $0x10] sm:$0xff]  }
 0x4dd   : > { %4189 = vmatprep.subr.bf16.mxu1 %v4810_v0 }
 0x4e0   : > { %4190 = vmatpush3.bf16.msra.mxu1 %v4439_v11  ;;  %v4472_v11 = vld [vmem:[#allocation8 + $0x58] sm:$0xff]  }
 0x4e1   : > { %4191 = vmatprep.subr.bf16.mxu1 %v4810_v0 }
 0x4e4   : > { %4192 = vmatpush3.bf16.msra.mxu1 %v4440_v14  ;;  %v4473_v14 = vld [vmem:[#allocation8 + $0x18] sm:$0xff]  }
 0x4e5   : > { %4193 = vmatprep.subr.bf16.mxu1 %v4810_v0 }
 0x592   : > { %v1131_v32 = vpop.f32.mrb[8].mxu1 }
 0x593   : > { %v4143_v33 = vpop.f32.mrb[9].mxu1  ;;  %v1136_v34 = vsel %vm1135_vm11, %v1131_v32, -inf }
 0x594   : > { %1137 = vmax.xlane.f32.xlu1 %v1136_v34  ;;  %v4441_v34 = vld [vmem:[#allocation5 + $0x38] sm:$0xff]  }
 0x595   : > { %4194 = vmatpush3.bf16.msra.mxu1 %v4441_v34  ;;  %v4479_v34 = vld [vmem:[#allocation8 + $0x30] sm:$0xff]  }
 0x596   : > { %v1215_v35 = vpop.f32.mrb[10].mxu1 }
 0x597   : > { %v4148_v36 = vpop.f32.mrb[11].mxu1  ;;  %v1219_v37 = vsel %vm1135_vm11, %v1215_v35, -inf }
 0x598   : > { %1220 = vmax.xlane.f32.xlu0 %v1219_v37 }
 0x59a   : > { %v1444_v38 = vpop.f32.mrb[12].mxu1 }
 0x59b   : > { %v4163_v39 = vpop.f32.mrb[13].mxu1  ;;  %v1448_v40 = vsel %vm1135_vm11, %v1444_v38, -inf }
 0x59c   : > { %1449 = vmax.xlane.f32.xlu0 %v1448_v40 }
 0x59e   : > { %v1601_v41 = vpop.f32.mrb[14].mxu1 }
 0x59f   : > { %v4173_v42 = vpop.f32.mrb[15].mxu1  ;;  %v1605_v43 = vsel %vm1135_vm11, %v1601_v41, -inf }
 0x5a0   : > { %1606 = vmax.xlane.f32.xlu1 %v1605_v43 }
 0x621   : > { %v1138_v44 = vpop.xlane.xlu1 %1137 }
 0x622   : > { %v1139_v45 = vsub.f32 %v1131_v32, %v1138_v44  ;;  %v4442_v44 = vld [vmem:[#allocation7] ss:$8 sps:$4 sm:$0xff]  }
 0x624   : > { %v1140_v46 = vmul.f32 1.442695, %v1139_v45  ;;  %v4444_v45 = vld [vmem:[#allocation7 + $0x4] ss:$8 sps:$4 sm:$0xff]  }
 0x625   : > { %v1221_v47 = vpop.xlane.xlu0 %1220 }
 0x626   : > { %4574 = vpow2.f32 %v1140_v46  ;;  %v1222_v49 = vsub.f32 %v1215_v35, %v1221_v47  ;;  %v4447_v46 = vld [vmem:[#allocation7 + $0x14] ss:$8 sps:$4 sm:$0xff]   ;;  %v4445_v47 = vld [vmem:[#allocation7 + $0x10] ss:$8 sps:$4 sm:$0xff]  }
 0x628   : > { %v1223_v50 = vmul.f32 1.442695, %v1222_v49  ;;  %v4450_v49 = vld [vmem:[#allocation7 + $0x24] ss:$8 sps:$4 sm:$0xff]  }
 0x629   : > { %v1450_v51 = vpop.xlane.xlu0 %1449 }
 0x62a   : > { %4576 = vpow2.f32 %v1223_v50  ;;  %v1451_v52 = vsub.f32 %v1444_v38, %v1450_v51  ;;  %v4448_v50 = vld [vmem:[#allocation7 + $0x20] ss:$8 sps:$4 sm:$0xff]  }
 0x62c   : > { %v1452_v53 = vmul.f32 1.442695, %v1451_v52 }
 0x62d   : > { %v1607_v54 = vpop.xlane.xlu1 %1606 }
 0x62e   : > { %4578 = vpow2.f32 %v1452_v53  ;;  %v1608_v55 = vsub.f32 %v1601_v41, %v1607_v54  ;;  %v4453_v54 = vld [vmem:[#allocation7 + $0x34] ss:$8 sps:$4 sm:$0xff]  }
 0x630   : > { %v4575_v56 = vpop.eup %4574  ;;  %v1609_v57 = vmul.f32 1.442695, %v1608_v55  ;;  %v4451_v55 = vld [vmem:[#allocation7 + $0x30] ss:$8 sps:$4 sm:$0xff]  }
 0x631   : > { %v1142_v58 = vsel %vm1135_vm11, %v4575_v56, 0.0 }
 0x632   : > { %4580 = vpow2.f32 %v1609_v57  ;;  %1143 = vadd.xlane.f32.xlu1 %v1142_v58  ;;  %v4454_v57 = vld [vmem:[#allocation7 + $0x40] ss:$8 sps:$4 sm:$0xff]   ;;  %v4459_v58 = vld [vmem:[#allocation7 + $0x54] ss:$8 sps:$4 sm:$0xff]  }
 0x634   : > { %v4577_v59 = vpop.eup %4576 }
 0x635   : > { %v1225_v60 = vsel %vm1135_vm11, %v4577_v59, 0.0 }
 0x636   : > { %1226 = vadd.xlane.f32.xlu0 %v1225_v60  ;;  %v4462_v60 = vld [vmem:[#allocation7 + $0x64] ss:$8 sps:$4 sm:$0xff]  }
 0x638   : > { %v4579_v61 = vpop.eup %4578 }
 0x639   : > { %v1454_v62 = vsel %vm1135_vm11, %v4579_v61, 0.0 }
 0x63a   : > { %1455 = vadd.xlane.f32.xlu0 %v1454_v62  ;;  %v4465_v62 = vld [vmem:[#allocation7 + $0x74] ss:$8 sps:$4 sm:$0xff]  }
 0x63c   : > { %v4581_v63 = vpop.eup %4580 }
 0x63d   : > { %v1611_v1 = vsel %vm1135_vm11, %v4581_v63, 0.0 }
 0x63e   : > { %1612 = vadd.xlane.f32.xlu1 %v1611_v1  ;;  %v4466_v1 = vld [vmem:[#allocation8 + $0x40] sm:$0xff]  }
 0x63f   : > { %4024 = vmatprep.subr.bf16.mxu1 %v4466_v1  ;;  %v4492_v1 = vld [vmem:[#allocation2 + $0xf4] ss:$12 sps:$4 sm:$0xff]  }
 0x6bf   : > { %v1144_v17 = vpop.xlane.xlu1 %1143 }
 0x6c3   : > { %v1227_v15 = vpop.xlane.xlu0 %1226 }
 0x6c4   : > { %4582 = vrcp.f32 %v1227_v15  ;;  %v4474_v15 = vld [vmem:[#allocation8 + $0x60] sm:$0xff]  }
 0x6c5   : > { %4584 = vrcp.f32 %v1144_v17  ;;  %v4475_v17 = vld [vmem:[#allocation8 + $0x20] sm:$0xff]  }
 0x6c7   : > { %v1456_v20 = vpop.xlane.xlu0 %1455 }
 0x6c8   : > { %4586 = vrcp.f32 %v1456_v20 }
 0x6cb   : > { %v1613_v25 = vpop.xlane.xlu1 %1612 }
 0x6cc   : > { %4588 = vrcp.f32 %v1613_v25  ;;  %v3856_v25 = vld [vmem:[%s5458_s11] ss:$0 sm:$0xff] }
 0x6ce   : > { %v4583_v18 = vpop.eup %4582 }
 0x6cf   : > { %v1229_v19 = vmul.f32 %v4583_v18, %v4577_v59  ;;  %v4585_v22 = vpop.eup %4584  ;;  %v4457_v59 = vld [vmem:[#allocation7 + $0x50] ss:$8 sps:$4 sm:$0xff]   ;;  %v4476_v18 = vld [vmem:[#allocation8 + $0x68] sm:$0xff]  }
 0x6d0   : > { %v1146_v23 = vmul.f32 %v4585_v22, %v4575_v56  ;;  %v4456_v56 = vld [vmem:[#allocation7 + $0x44] ss:$8 sps:$4 sm:$0xff]  }
 0x6d1   : > { %4152 = vmatmul.mubr.msk.f32.vlgmr.msra.gmra.mrb[4].mxu0 %vm1135_vm11, %v1229_v19  ;;  %v4477_v19 = vld [vmem:[#allocation8 + $0x28] sm:$0xff]  }
 0x6d2   : > { %4155 = vmatpush3.msra.mxu0 %v1147_v21  ;;  %4156 = vmatprep.mubr.msk.f32.mxu0 %vm4811_vm0, %v4810_v0  ;;  %v4587_v27 = vpop.eup %4586 }
 0x6d3   : > { %4164 = vmatprep.subr.mxu0 %v4810_v0  ;;  %v1458_v29 = vmul.f32 %v4587_v27, %v4579_v61  ;;  %v4460_v61 = vld [vmem:[#allocation7 + $0x60] ss:$8 sps:$4 sm:$0xff]  }
 0x6d4   : > { %v3857_v27 = vld [vmem:[%s5459_s12] ss:$0 sm:$0xff] }
 0x6d6   : > { %v4589_v32 = vpop.eup %4588 }
 0x6d7   : > { %v1615_v33 = vmul.f32 %v4589_v32, %v4581_v63  ;;  %v4463_v63 = vld [vmem:[#allocation7 + $0x70] ss:$8 sps:$4 sm:$0xff]  }
 0x6d9   : > { %4157 = vmatmul.mubr.msk.f32.vlgmr.msra.gmra.mrb[4].mxu0 %vm1135_vm11, %v1146_v23 }
 0x6da   : > { %4165 = vmatpush3.msra.mxu0 %v1459_v26  ;;  %4166 = vmatprep.mubr.msk.f32.mxu0 %vm4811_vm0, %v4810_v0 }
 0x6db   : > { %4174 = vmatprep.subr.mxu0 %v4810_v0 }
 0x6e1   : > { %4167 = vmatmul.mubr.msk.f32.vlgmr.msra.gmra.mrb[4].mxu0 %vm1135_vm11, %v1458_v29 }
 0x6e2   : > { %4175 = vmatpush3.msra.mxu0 %v1616_v31  ;;  %4176 = vmatprep.mubr.msk.f32.mxu0 %vm4811_vm0, %v4810_v0 }
 0x6e3   : > { %1941 = vmatprep.subr.bf16.mxu0 %v4444_v45 }
 0x6e9   : > { %4177 = vmatmul.mubr.msk.f32.vlgmr.msra.gmra.mrb[4].mxu0 %vm1135_vm11, %v1615_v33  ;;  %v4478_v33 = vld [vmem:[#allocation8 + $0x70] sm:$0xff]  }
 0x6ea   : > { %1973 = vmatprep.mubr.bf16.mxu0 %v4812_v48  ;;  %1942 = vmatpush1.bf16.msra.mxu0 %v4442_v44 }
 0x6eb   : > { %1943 = vmatprep.subr.bf16.mxu0 %v4447_v46 }
 0x6ee   : > { %1944 = vmatpush1.bf16.msra.mxu0 %v4445_v47 }
 0x6ef   : > { %1945 = vmatprep.subr.bf16.mxu0 %v4450_v49 }
 0x6f2   : > { %1946 = vmatpush1.bf16.msra.mxu0 %v4448_v50 }
 0x6f3   : > { %1947 = vmatprep.subr.bf16.mxu0 %v4453_v54 }
 0x6f6   : > { %1948 = vmatpush1.bf16.msra.mxu0 %v4451_v55  ;;  %v3890_v55 = vld [vmem:[%s5463_s16] ss:$0 sm:$0xff] }
 0x6f7   : > { %1949 = vmatprep.subr.bf16.mxu0 %v4456_v56 }
 0x6fa   : > { %1950 = vmatpush1.bf16.msra.mxu0 %v4454_v57 }
 0x6fb   : > { %1951 = vmatprep.subr.bf16.mxu0 %v4459_v58  ;;  %v4482_v58 = vld [vmem:[#allocation2 + $0xc0] ss:$12 sps:$4 sm:$0xff]  }
 0x6fe   : > { %1952 = vmatpush1.bf16.msra.mxu0 %v4457_v59  ;;  %v4484_v59 = vld [vmem:[#allocation2 + $0xc4] ss:$12 sps:$4 sm:$0xff]  }
 0x6ff   : > { %1953 = vmatprep.subr.bf16.mxu0 %v4462_v60  ;;  %v4485_v60 = vld [vmem:[#allocation2 + $0xc8] ss:$12 sps:$4 sm:$0xff]  }
 0x702   : > { %1954 = vmatpush1.bf16.msra.mxu0 %v4460_v61  ;;  %v4488_v61 = vld [vmem:[#allocation2 + $0xdc] ss:$12 sps:$4 sm:$0xff]  }
 0x703   : > { %1955 = vmatprep.subr.bf16.mxu0 %v4465_v62  ;;  %v4489_v62 = vld [vmem:[#allocation2 + $0xe0] ss:$12 sps:$4 sm:$0xff]  }
 0x706   : > { %1956 = vmatpush1.bf16.msra.mxu0 %v4463_v63  ;;  %v4486_v63 = vld [vmem:[#allocation2 + $0xd8] ss:$12 sps:$4 sm:$0xff]  }
 0x707   : > { %2372 = vmatprep.subr.bf16.mxu0 %v4484_v59 }
 0x7bc   : > { %v1686_v35 = vpop.f32.mrb[4].mxu0 }
 0x7bd   : > { %v1707_v36 = vpack.c.bf16 %v1686_v35, %v1686_v35  ;;  %v4178_v37 = vpop.f32.mrb[5].mxu0  ;;  %v4480_v35 = vld [vmem:[#allocation8 + $0x78] sm:$0xff]  }
 0x7be   : > { %v1849_v37 = vld [vmem:[%s5461_s14] sm:$0x3] }
 0x7bf   : > { %4196 = vmatmul.mubr.bf16.vlgmr.msra.gmra.mrb[16].mxu1 %v1707_v36  ;;  %v4481_v36 = vld [vmem:[#allocation8 + $0x38] sm:$0xff]  }
 0x7c0   : > { %4025 = vmatpush3.bf16.msra.mxu1 %v4467_v3 }
 0x7c1   : > { %4026 = vmatprep.subr.bf16.mxu1 %v4468_v5 }
 0x7c4   : > { %4027 = vmatpush3.bf16.msra.mxu1 %v4469_v7 }
 0x7c5   : > { %4028 = vmatprep.subr.bf16.mxu1 %v4470_v8 }
 0x7c8   : > { %4029 = vmatpush3.bf16.msra.mxu1 %v4471_v10  ;;  %v4493_v10 = vld [vmem:[#allocation2 + $0xf8] ss:$12 sps:$4 sm:$0xff]  }
 0x7c9   : > { %4030 = vmatprep.subr.bf16.mxu1 %v4472_v11  ;;  %v4496_v11 = vld [vmem:[#allocation2 + $0x10c] ss:$12 sps:$4 sm:$0xff]  }
 0x7cc   : > { %4031 = vmatpush3.bf16.msra.mxu1 %v4473_v14  ;;  %v4494_v14 = vld [vmem:[#allocation2 + $0x108] ss:$12 sps:$4 sm:$0xff]  }
 0x7cd   : > { %4032 = vmatprep.subr.bf16.mxu1 %v4474_v15  ;;  %v4497_v15 = vld [vmem:[#allocation2 + $0x110] ss:$12 sps:$4 sm:$0xff]  }
 0x7d0   : > { %4033 = vmatpush3.bf16.msra.mxu1 %v4475_v17  ;;  %v4500_v17 = vld [vmem:[#allocation2 + $0x124] ss:$12 sps:$4 sm:$0xff]  }
 0x7d1   : > { %4034 = vmatprep.subr.bf16.mxu1 %v4476_v18  ;;  %v4498_v18 = vld [vmem:[#allocation2 + $0x120] ss:$12 sps:$4 sm:$0xff]  }
 0x7d4   : > { %4035 = vmatpush3.bf16.msra.mxu1 %v4477_v19  ;;  %v4501_v19 = vld [vmem:[#allocation2 + $0x128] ss:$12 sps:$4 sm:$0xff]  }
 0x7d5   : > { %4036 = vmatprep.subr.bf16.mxu1 %v4478_v33 }
 0x7d8   : > { %4037 = vmatpush3.bf16.msra.mxu1 %v4479_v34 }
 0x7d9   : > { %4038 = vmatprep.subr.bf16.mxu1 %v4480_v35 }
 0x7dc   : > { %4039 = vmatpush3.bf16.msra.mxu1 %v4481_v36  ;;  %v3893_v36 = vld [vmem:[%s5456_s9 + $0x1] ss:$0 sm:$0xff] }
 0x7dd   : > { %4199 = vmatprep.subr.bf16.mxu1 %v4810_v0 }
 0x892   : > { %v1790_v38 = vpop.f32.mrb[16].mxu1 }
 0x893   : > { %v1796_v39 = vadd.f32 %v1790_v38, %v5108_v24  ;;  %v4197_v40 = vpop.f32.mrb[17].mxu1  ;;  %v1854_v38 = vrot.slane %v1849_v37, %v5145_v9 }
 0x894   : > { %v1793_v41 = vpop.f32.mrb[18].mxu1 }
 0x895   : > { %v5219_v42 = vadd.f32 %v3855_v13, %v1796_v39  ;;  %v4198_v43 = vpop.f32.mrb[19].mxu1  ;;  %v1858_v13 = vrot.slane %v1849_v37, %v5139_v6 }
 0x897   : > { %1807 = vadd.xlane.f32.xlu0 %v5219_v42 }
 0x924   : > { %v1808_v24 = vpop.xlane.xlu0 %1807 }
 0x925   : > { %v1809_v51 = vmul.f32 0.0078125, %v1808_v24 }
 0x927   : > { %v1810_v52 = vsub.f32 %v5219_v42, %v1809_v51 }
 0x929   : > { %v1811_v53 = vmul.f32 %v1810_v52, %v1810_v52 }
 0x92b   : > { %1812 = vadd.xlane.f32.xlu1 %v1811_v53 }
 0x9b8   : > { %v1813_v20 = vpop.xlane.xlu1 %1812 }
 0x9b9   : > { %v1814_v21 = vmul.f32 0.0078125, %v1813_v20  ;;  %v4504_v20 = vld [vmem:[#allocation2 + $0x13c] ss:$12 sps:$4 sm:$0xff]  }
 0x9bb   : > { %v1815_v22 = vadd.f32 1e-05, %v1814_v21  ;;  %v4502_v21 = vld [vmem:[#allocation2 + $0x138] ss:$12 sps:$4 sm:$0xff]  }
 0x9bd   : > { %4590 = vrsqrt.f32 %v1815_v22  ;;  %v4505_v22 = vld [vmem:[#allocation2 + $0x140] ss:$12 sps:$4 sm:$0xff]  }
 0x9c7   : > { %v4591_v23 = vpop.eup %4590 }
 0x9c8   : > { %v1817_v26 = vmul.f32 %v4591_v23, %v1810_v52  ;;  %v4508_v23 = vld [vmem:[#allocation2 + $0x154] ss:$12 sps:$4 sm:$0xff]  }
 0x9ca   : > { %v1824_v29 = vmul.f32 %v3856_v25, %v1817_v26  ;;  %v4506_v25 = vld [vmem:[#allocation2 + $0x150] ss:$12 sps:$4 sm:$0xff]   ;;  %v4509_v26 = vld [vmem:[#allocation2 + $0x158] ss:$12 sps:$4 sm:$0xff]  }
 0x9cc   : > { %v1831_v31 = vadd.f32 %v3857_v27, %v1824_v29  ;;  %v4512_v27 = vld [vmem:[#allocation2 + $0x16c] ss:$12 sps:$4 sm:$0xff]   ;;  %v4510_v29 = vld [vmem:[#allocation2 + $0x168] ss:$12 sps:$4 sm:$0xff]  }
 0x9ce   : > { %v1848_v32 = vpack.c.bf16 %v1831_v31, %v1831_v31  ;;  %v4513_v31 = vld [vmem:[#allocation2 + $0x170] ss:$12 sps:$4 sm:$0xff]  }
 0x9d0   : > { %1974 = vmatmul.mubr.bf16.vlgmr.msra.gmra.mrb[8].mxu0 %v1848_v32 }
 0x9d1   : > { %2404 = vmatprep.mubr.bf16.mxu0 %v4812_v48  ;;  %2373 = vmatpush1.bf16.msra.mxu0 %v4482_v58 }
 0x9d2   : > { %2374 = vmatprep.subr.bf16.mxu0 %v4488_v61 }
 0x9d5   : > { %2375 = vmatpush1.bf16.msra.mxu0 %v4486_v63 }
 0x9d6   : > { %2376 = vmatprep.subr.bf16.mxu0 %v4492_v1 }
 0xaa3   : > { %v1975_v39 = vpop.f32.mrb[8].mxu0 }
 0xaa4   : > { %v1976_v40 = vadd.f32 %v1975_v39, %v1854_v38  ;;  %v1977_v41 = vpop.f32.mrb[9].mxu0  ;;  %v3894_v38 = vld [vmem:[%s5457_s10 + $0x1] ss:$0 sm:$0xff] }
 0xaa5   : > { %v1978_v43 = vadd.f32 %v1977_v41, %v1858_v13  ;;  %v1979_v44 = vpop.f32.mrb[10].mxu0  ;;  %v3895_v41 = vld [vmem:[%s5453_s6 + $0x3] sm:$0x7] }
 0xaa6   : > { %v1982_v45 = vmax.f32 %v1976_v40, 0.0  ;;  %v1980_v46 = vpop.f32.mrb[11].mxu0 }
 0xaa7   : > { %v1983_v47 = vmax.f32 %v1978_v43, 0.0  ;;  %v2236_v43 = vrot.slane %v3895_v41, %v5139_v6 }
 0xaa8   : > { %v2016_v50 = vpack.c.bf16 %v1982_v45, %v1982_v45 }
 0xaa9   : > { %v2017_v49 = vpack.c.bf16 %v1983_v47, %v1983_v47 }
 0xaab   : > { %2146 = vmatprep.mubr.bf16.mxu1 %v2017_v49 }
 0xaac   : > { %2147 = vmatmul.mubr.bf16.vlgmr.msra.gmra.mrb[20].mxu1 %v2016_v50 }
 0xaad   : > { %4215 = vmatprep.mubr.msk.bf16.mxu1 %vm4811_vm0, %v4810_v0  ;;  %4200 = vmatpush3.bf16.msra.mxu1 %v4485_v60 }
 0xaae   : > { %4201 = vmatprep.subr.bf16.mxu1 %v4810_v0 }
 0xab1   : > { %4202 = vmatpush3.bf16.msra.mxu1 %v4489_v62 }
 0xab2   : > { %4203 = vmatprep.subr.bf16.mxu1 %v4810_v0 }
 0xab5   : > { %4204 = vmatpush3.bf16.msra.mxu1 %v4493_v10 }
 0xab6   : > { %4205 = vmatprep.subr.bf16.mxu1 %v4810_v0 }
 0xab9   : > { %4206 = vmatpush3.bf16.msra.mxu1 %v4497_v15 }
 0xaba   : > { %4207 = vmatprep.subr.bf16.mxu1 %v4810_v0 }
 0xabd   : > { %4208 = vmatpush3.bf16.msra.mxu1 %v4501_v19 }
 0xabe   : > { %4209 = vmatprep.subr.bf16.mxu1 %v4810_v0 }
 0xac1   : > { %4210 = vmatpush3.bf16.msra.mxu1 %v4505_v22 }
 0xac2   : > { %4211 = vmatprep.subr.bf16.mxu1 %v4810_v0 }
 0xac5   : > { %4212 = vmatpush3.bf16.msra.mxu1 %v4509_v26 }
 0xac6   : > { %4213 = vmatprep.subr.bf16.mxu1 %v4810_v0 }
 0xac9   : > { %4214 = vmatpush3.bf16.msra.mxu1 %v4513_v31 }
 0xaca   : > { %4259 = vmatprep.subr.bf16.mxu1 %v4810_v0 }
 0xb7f   : > { %v4040_v24 = vpop.f32.mrb[20].mxu1 }
 0xb80   : > { %v4041_v51 = vpop.f32.mrb[21].mxu1 }
 0xb81   : > { %v4042_v52 = vadd.f32 %v4041_v51, %v4040_v24  ;;  %v4043_v53 = vpop.f32.mrb[22].mxu1  ;;  %v2232_v51 = vrot.slane %v3895_v41, %v5145_v9 }
 0xb82   : > { %v4044_v54 = vpop.f32.mrb[23].mxu1 }
 0xb83   : > { %v2154_v56 = vadd.f32 %v4042_v52, %v5219_v42  ;;  %v4490_v42 = vld [vmem:[#allocation2 + $0xf0] ss:$12 sps:$4 sm:$0xff]   ;;  %v2240_v54 = vrot.slane %v3895_v41, %v850_v4 }
 0xb84   : > { %2377 = vmatpush1.bf16.msra.mxu0 %v4490_v42 }
 0xb85   : > { %v5242_v57 = vadd.f32 %v3890_v55, %v2154_v56  ;;  %2378 = vmatprep.subr.bf16.mxu0 %v4496_v11 }
 0xb87   : > { %2167 = vadd.xlane.f32.xlu0 %v5242_v57 }
 0xb88   : > { %2379 = vmatpush1.bf16.msra.mxu0 %v4494_v14 }
 0xb89   : > { %2380 = vmatprep.subr.bf16.mxu0 %v4500_v17 }
 0xb8c   : > { %2381 = vmatpush1.bf16.msra.mxu0 %v4498_v18 }
 0xb8d   : > { %2382 = vmatprep.subr.bf16.mxu0 %v4504_v20 }
 0xb90   : > { %2383 = vmatpush1.bf16.msra.mxu0 %v4502_v21 }
 0xb91   : > { %2384 = vmatprep.subr.bf16.mxu0 %v4508_v23 }
 0xb94   : > { %2385 = vmatpush1.bf16.msra.mxu0 %v4506_v25 }
 0xb95   : > { %2386 = vmatprep.subr.bf16.mxu0 %v4512_v27 }
 0xb98   : > { %2387 = vmatpush1.bf16.msra.mxu0 %v4510_v29 }
 0xb99   : > { %4219 = vmatprep.subr.mxu0 %v4810_v0 }
 0xc14   : > { %v2168_v3 = vpop.xlane.xlu0 %2167 }
 0xc15   : > { %v2169_v5 = vmul.f32 0.0078125, %v2168_v3 }
 0xc17   : > { %v2170_v7 = vsub.f32 %v5242_v57, %v2169_v5 }
 0xc19   : > { %v2171_v8 = vmul.f32 %v2170_v7, %v2170_v7 }
 0xc1b   : > { %2172 = vadd.xlane.f32.xlu1 %v2171_v8 }
 0xca8   : > { %v2173_v32 = vpop.xlane.xlu1 %2172 }
 0xca9   : > { %v2174_v33 = vmul.f32 0.0078125, %v2173_v32 }
 0xcab   : > { %v2175_v34 = vadd.f32 1e-05, %v2174_v33 }
 0xcad   : > { %4592 = vrsqrt.f32 %v2175_v34 }
 0xcb7   : > { %v4593_v35 = vpop.eup %4592 }
 0xcb8   : > { %v2177_v37 = vmul.f32 %v4593_v35, %v2170_v7 }
 0xcba   : > { %v2184_v13 = vmul.f32 %v3893_v36, %v2177_v37 }
 0xcbc   : > { %v2191_v39 = vadd.f32 %v3894_v38, %v2184_v13 }
 0xcbe   : > { %v2225_v40 = vpack.c.bf16 %v2191_v39, %v2191_v39 }
 0xcc0   : > { %2405 = vmatmul.mubr.bf16.vlgmr.msra.gmra.mrb[12].mxu0 %v2225_v40  ;;  %4216 = vmatmul.mubr.bf16.vlgmr.msra.gmra.mrb[24].mxu1 %v2225_v40 }
 0xcc1   : > { %4221 = vmatprep.mubr.msk.f32.mxu0 %vm4811_vm0, %v4810_v0  ;;  %4275 = vmatprep.mubr.msk.bf16.mxu1 %vm4811_vm0, %v4810_v0 }
 0xd93   : > { %v2406_v44 = vpop.f32.mrb[12].mxu0  ;;  %v2447_v45 = vpop.f32.mrb[24].mxu1 }
 0xd94   : > { %v2408_v46 = vpop.f32.mrb[13].mxu0  ;;  %v4217_v47 = vpop.f32.mrb[25].mxu1  ;;  %v5276_v56 = vadd.f32 %v2406_v44, %v2232_v51  ;;  %v5279_v58 = vadd.f32 %v2447_v45, %v2240_v54  ;;  %v4518_v51 = vld [vmem:[#allocation5 + $0x60] sm:$0xff]  }
 0xd95   : > { %v5269_v49 = vadd.f32 %v2408_v46, %v2236_v43  ;;  %v2410_v50 = vpop.f32.mrb[14].mxu0  ;;  %v2450_v24 = vpop.f32.mrb[26].mxu1 }
 0xd96   : > { %v2411_v52 = vpop.f32.mrb[15].mxu0  ;;  %v4218_v53 = vpop.f32.mrb[27].mxu1  ;;  %v2618_v2 = vmul.f32 %v5148_v12, %v5279_v58  ;;  %v2535_v21 = vmul.f32 %v5153_v16, %v5279_v58  ;;  %v3004_v13 = vmul.f32 %v5170_v30, %v5279_v58  ;;  %v4516_v50 = vld [vmem:[#allocation5 + $0x50] sm:$0xff]   ;;  %v4517_v24 = vld [vmem:[#allocation5 + $0x58] sm:$0xff]  }
 0xd97   : > { %v2453_v55 = vmul.f32 %v5153_v16, %v5269_v49  ;;  %v2536_v59 = vmul.f32 %v5148_v12, %v5269_v49  ;;  %v2765_v25 = vmul.f32 %v5163_v28, %v5269_v49  ;;  %v2847_v16 = vmul.f32 %v5163_v28, %v5279_v58  ;;  %v4519_v52 = vld [vmem:[#allocation5 + $0x68] sm:$0xff]   ;;  %v4520_v53 = vld [vmem:[#allocation5 + $0x70] sm:$0xff]   ;;  %v4521_v58 = vld [vmem:[#allocation5 + $0x78] sm:$0xff]  }
 0xd98   : > { %v2922_v38 = vmul.f32 %v5170_v30, %v5269_v49  ;;  %v4514_v30 = vld [vmem:[#allocation5 + $0x40] sm:$0xff]   ;;  %v4515_v49 = vld [vmem:[#allocation5 + $0x48] sm:$0xff]  }
 0xd99   : > { %4220 = vmatpush3.xpose.msra.mxu0 %v2453_v55  ;;  %4260 = vmatpush3.bf16.msra.mxu1 %v4514_v30 }
 0xd9a   : > { %4224 = vmatprep.subr.mxu0 %v4810_v0  ;;  %4261 = vmatprep.subr.bf16.mxu1 %v4810_v0 }
 0xd9c   : > { %4222 = vmatmul.mubr.f32.vlgmr.msra.gmra.mrb[6].mxu0 %v5276_v56 }
 0xd9d   : > { %4225 = vmatpush3.xpose.msra.mxu0 %v2536_v59  ;;  %4226 = vmatprep.mubr.msk.f32.mxu0 %vm4811_vm0, %v4810_v0 }
 0xd9e   : > { %4229 = vmatprep.subr.mxu0 %v4810_v0  ;;  %4262 = vmatpush3.bf16.msra.mxu1 %v4515_v49 }
 0xd9f   : > { %4263 = vmatprep.subr.bf16.mxu1 %v4810_v0 }
 0xda0   : > { %4227 = vmatmul.mubr.f32.vlgmr.msra.gmra.mrb[16].mxu0 %v5276_v56 }
 0xda1   : > { %4230 = vmatpush3.msra.mxu0 %v2618_v2  ;;  %4231 = vmatprep.mubr.msk.f32.mxu0 %vm4811_vm0, %v4810_v0 }
 0xda2   : > { %4234 = vmatprep.subr.mxu0 %v4810_v0  ;;  %4264 = vmatpush3.bf16.msra.mxu1 %v4516_v50  ;;  %v4558_v50 = vld [vmem:[#allocation8 + $0xf0] sm:$0xff]  }
 0xda3   : > { %4265 = vmatprep.subr.bf16.mxu1 %v4810_v0 }
 0xda6   : > { %4266 = vmatpush3.bf16.msra.mxu1 %v4517_v24  ;;  %v4559_v24 = vld [vmem:[#allocation8 + $0xb0] sm:$0xff]  }
 0xda7   : > { %4267 = vmatprep.subr.bf16.mxu1 %v4810_v0 }
 0xdaa   : > { %4268 = vmatpush3.bf16.msra.mxu1 %v4518_v51  ;;  %v4560_v51 = vld [vmem:[#allocation8 + $0xf8] sm:$0xff]  }
 0xdab   : > { %4269 = vmatprep.subr.bf16.mxu1 %v4810_v0 }
 0xdae   : > { %4270 = vmatpush3.bf16.msra.mxu1 %v4519_v52  ;;  %v4561_v52 = vld [vmem:[#allocation8 + $0xb8] sm:$0xff]  }
 0xdaf   : > { %4271 = vmatprep.subr.bf16.mxu1 %v4810_v0 }
 0xdb2   : > { %4272 = vmatpush3.bf16.msra.mxu1 %v4520_v53  ;;  %v4562_v53 = vld [vmem:[%s5464_s17] sm:$0xff]  }
 0xdb3   : > { %4273 = vmatprep.subr.bf16.mxu1 %v4810_v0 }
 0xdb6   : > { %4274 = vmatpush3.bf16.msra.mxu1 %v4521_v58  ;;  %v4566_v58 = vld [vmem:[%s5464_s17 + $0x20] sm:$0xff]  }
 0xe6f   : > { %v2520_v4 = vpop.f32.mrb[6].mxu0 }
 0xe70   : > { %v4223_v60 = vpop.f32.mrb[7].mxu0  ;;  %v2524_v61 = vsel %vm1135_vm11, %v2520_v4, -inf }
 0xe71   : > { %2525 = vmax.xlane.f32.xlu1 %v2524_v61  ;;  %v3933_v61 = vld [vmem:[%s5455_s8 + $0x1] ss:$0 sm:$0xff] }
 0xe73   : > { %v2603_v62 = vpop.f32.mrb[16].mxu0 }
 0xe74   : > { %v4228_v63 = vpop.f32.mrb[17].mxu0  ;;  %v2607_v1 = vsel %vm1135_vm11, %v2603_v62, -inf }
 0xe75   : > { %2608 = vmax.xlane.f32.xlu0 %v2607_v1 }
 0xefe   : > { %v2526_v42 = vpop.xlane.xlu1 %2525 }
 0xeff   : > { %v2527_v12 = vsub.f32 %v2520_v4, %v2526_v42 }
 0xf01   : > { %v2528_v3 = vmul.f32 1.442695, %v2527_v12 }
 0xf02   : > { %v2609_v5 = vpop.xlane.xlu0 %2608 }
 0xf03   : > { %4594 = vpow2.f32 %v2528_v3  ;;  %v2610_v7 = vsub.f32 %v2603_v62, %v2609_v5  ;;  %v4524_v3 = vld [vmem:[#allocation7 + $0x84] ss:$8 sps:$4 sm:$0xff]   ;;  %v4527_v5 = vld [vmem:[#allocation7 + $0x94] ss:$8 sps:$4 sm:$0xff]  }
 0xf05   : > { %v2611_v8 = vmul.f32 1.442695, %v2610_v7  ;;  %v4525_v7 = vld [vmem:[#allocation7 + $0x90] ss:$8 sps:$4 sm:$0xff]  }
 0xf07   : > { %4596 = vpow2.f32 %v2611_v8  ;;  %v4530_v8 = vld [vmem:[#allocation7 + $0xa4] ss:$8 sps:$4 sm:$0xff]  }
 0xf0d   : > { %v4595_v10 = vpop.eup %4594 }
 0xf0e   : > { %v2530_v11 = vsel %vm1135_vm11, %v4595_v10, 0.0 }
 0xf0f   : > { %2531 = vadd.xlane.f32.xlu1 %v2530_v11 }
 0xf11   : > { %v4597_v14 = vpop.eup %4596 }
 0xf12   : > { %v2613_v15 = vsel %vm1135_vm11, %v4597_v14, 0.0 }
 0xf13   : > { %2614 = vadd.xlane.f32.xlu0 %v2613_v15 }
 0xf9c   : > { %v2532_v18 = vpop.xlane.xlu1 %2531 }
 0xfa0   : > { %v2615_v17 = vpop.xlane.xlu0 %2614 }
 0xfa1   : > { %4598 = vrcp.f32 %v2615_v17  ;;  %v4533_v17 = vld [vmem:[#allocation7 + $0xb4] ss:$8 sps:$4 sm:$0xff]  }
 0xfa2   : > { %4600 = vrcp.f32 %v2532_v18  ;;  %v4531_v18 = vld [vmem:[#allocation7 + $0xb0] ss:$8 sps:$4 sm:$0xff]  }
 0xfab   : > { %v4599_v19 = vpop.eup %4598 }
 0xfac   : > { %v2617_v20 = vmul.f32 %v4599_v19, %v4597_v14  ;;  %v4601_v22 = vpop.eup %4600  ;;  %v4536_v19 = vld [vmem:[#allocation7 + $0xc4] ss:$8 sps:$4 sm:$0xff]  }
 0xfad   : > { %v2534_v23 = vmul.f32 %v4601_v22, %v4595_v10  ;;  %v4528_v10 = vld [vmem:[#allocation7 + $0xa0] ss:$8 sps:$4 sm:$0xff]   ;;  %v4537_v22 = vld [vmem:[#allocation7 + $0xd0] ss:$8 sps:$4 sm:$0xff]  }
 0xfae   : > { %4232 = vmatmul.mubr.msk.f32.vlgmr.msra.gmra.mrb[18].mxu0 %vm1135_vm11, %v2617_v20  ;;  %v4534_v20 = vld [vmem:[#allocation7 + $0xc0] ss:$8 sps:$4 sm:$0xff]  }
 0xfaf   : > { %4235 = vmatpush3.msra.mxu0 %v2535_v21  ;;  %4236 = vmatprep.mubr.msk.f32.mxu0 %vm4811_vm0, %v4810_v0  ;;  %v4539_v21 = vld [vmem:[#allocation7 + $0xd4] ss:$8 sps:$4 sm:$0xff]  }
 0xfb0   : > { %4239 = vmatprep.subr.mxu0 %v4810_v0 }
 0xfb6   : > { %4237 = vmatmul.mubr.msk.f32.vlgmr.msra.gmra.mrb[18].mxu0 %vm1135_vm11, %v2534_v23  ;;  %v4542_v23 = vld [vmem:[#allocation7 + $0xe4] ss:$8 sps:$4 sm:$0xff]  }
 0xfb7   : > { %4240 = vmatpush3.xpose.msra.mxu0 %v2765_v25  ;;  %4241 = vmatprep.mubr.msk.f32.mxu0 %vm4811_vm0, %v4810_v0  ;;  %v4540_v25 = vld [vmem:[#allocation7 + $0xe0] ss:$8 sps:$4 sm:$0xff]  }
 0xfb8   : > { %4244 = vmatprep.subr.mxu0 %v4810_v0 }
 0xfba   : > { %4242 = vmatmul.mubr.f32.vlgmr.msra.gmra.mrb[20].mxu0 %v5276_v56 }
 0xfbb   : > { %4245 = vmatpush3.msra.mxu0 %v2847_v16  ;;  %4246 = vmatprep.mubr.msk.f32.mxu0 %vm4811_vm0, %v4810_v0  ;;  %v4545_v16 = vld [vmem:[#allocation7 + $0xf4] ss:$8 sps:$4 sm:$0xff]  }
 0xfbc   : > { %4249 = vmatprep.subr.mxu0 %v4810_v0 }
0x108d   : > { %v2832_v26 = vpop.f32.mrb[20].mxu0 }
0x108e   : > { %v4243_v27 = vpop.f32.mrb[21].mxu0  ;;  %v2836_v29 = vsel %vm1135_vm11, %v2832_v26, -inf }
0x108f   : > { %2837 = vmax.xlane.f32.xlu0 %v2836_v29  ;;  %v4546_v27 = vld [vmem:[#allocation8 + $0xc0] sm:$0xff]  }
0x1090   : > { %v4547_v29 = vld [vmem:[#allocation8 + $0x80] sm:$0xff]   ;;  %4080 = vmatprep.subr.bf16.mxu1 %v4546_v27 }
0x111c   : > { %v2838_v31 = vpop.xlane.xlu0 %2837 }
0x111d   : > { %v2839_v32 = vsub.f32 %v2832_v26, %v2838_v31  ;;  %v4543_v26 = vld [vmem:[#allocation7 + $0xf0] ss:$8 sps:$4 sm:$0xff]   ;;  %v4548_v31 = vld [vmem:[#allocation8 + $0xc8] sm:$0xff]  }
0x111f   : > { %v2840_v33 = vmul.f32 1.442695, %v2839_v32  ;;  %v4549_v32 = vld [vmem:[#allocation8 + $0x88] sm:$0xff]  }
0x1121   : > { %4602 = vpow2.f32 %v2840_v33  ;;  %v4550_v33 = vld [vmem:[#allocation8 + $0xd0] sm:$0xff]  }
0x112b   : > { %v4603_v34 = vpop.eup %4602 }
0x112c   : > { %v2842_v28 = vsel %vm1135_vm11, %v4603_v34, 0.0 }
0x112d   : > { %2843 = vadd.xlane.f32.xlu1 %v2842_v28  ;;  %v4552_v28 = vld [vmem:[#allocation8 + $0xd8] sm:$0xff]  }
0x11ba   : > { %v2844_v35 = vpop.xlane.xlu1 %2843 }
0x11bb   : > { %4604 = vrcp.f32 %v2844_v35  ;;  %v4553_v35 = vld [vmem:[#allocation8 + $0x98] sm:$0xff]  }
0x11c5   : > { %v4605_v36 = vpop.eup %4604 }
0x11c6   : > { %v2846_v37 = vmul.f32 %v4605_v36, %v4603_v34  ;;  %v4551_v34 = vld [vmem:[#allocation8 + $0x90] sm:$0xff]   ;;  %v4554_v36 = vld [vmem:[#allocation8 + $0xe0] sm:$0xff]  }
0x11c8   : > { %4247 = vmatmul.mubr.msk.f32.vlgmr.msra.gmra.mrb[18].mxu0 %vm1135_vm11, %v2846_v37  ;;  %v4555_v37 = vld [vmem:[#allocation8 + $0xa0] sm:$0xff]  }
0x11c9   : > { %4250 = vmatpush3.xpose.msra.mxu0 %v2922_v38  ;;  %4251 = vmatprep.mubr.msk.f32.mxu0 %vm4811_vm0, %v4810_v0  ;;  %v4556_v38 = vld [vmem:[#allocation8 + $0xe8] sm:$0xff]  }
0x11ca   : > { %4254 = vmatprep.subr.mxu0 %v4810_v0 }
0x11cc   : > { %4252 = vmatmul.mubr.f32.vlgmr.msra.gmra.mrb[22].mxu0 %v5276_v56 }
0x11cd   : > { %4255 = vmatpush3.msra.mxu0 %v3004_v13  ;;  %4256 = vmatprep.mubr.msk.f32.mxu0 %vm4811_vm0, %v4810_v0  ;;  %v4557_v13 = vld [vmem:[#allocation8 + $0xa8] sm:$0xff]  }
0x11ce   : > { %3335 = vmatprep.subr.bf16.mxu0 %v4524_v3 }
0x129f   : > { %v2989_v39 = vpop.f32.mrb[22].mxu0 }
0x12a0   : > { %v4253_v40 = vpop.f32.mrb[23].mxu0  ;;  %v2993_v41 = vsel %vm1135_vm11, %v2989_v39, -inf }
0x12a1   : > { %2994 = vmax.xlane.f32.xlu0 %v2993_v41 }
0x132e   : > { %v2995_v43 = vpop.xlane.xlu0 %2994 }
0x132f   : > { %v2996_v44 = vsub.f32 %v2989_v39, %v2995_v43 }
0x1331   : > { %v2997_v45 = vmul.f32 1.442695, %v2996_v44  ;;  %v3936_v44 = vld [vmem:[%s5458_s11 + $0x1] ss:$0 sm:$0xff] }
0x1333   : > { %4606 = vpow2.f32 %v2997_v45 }
0x133d   : > { %v4607_v46 = vpop.eup %4606 }
0x133e   : > { %v2999_v47 = vsel %vm1135_vm11, %v4607_v46, 0.0 }
0x133f   : > { %3000 = vadd.xlane.f32.xlu1 %v2999_v47 }
0x13cc   : > { %v3001_v54 = vpop.xlane.xlu1 %3000 }
0x13cd   : > { %4608 = vrcp.f32 %v3001_v54  ;;  %v4563_v54 = vld [vmem:[%s5464_s17 + $0x8] sm:$0xff]  }
0x13d7   : > { %v4609_v55 = vpop.eup %4608 }
0x13d8   : > { %v3003_v56 = vmul.f32 %v4609_v55, %v4607_v46  ;;  %v3937_v46 = vld [vmem:[%s5459_s12 + $0x1] ss:$0 sm:$0xff]  ;;  %v4564_v55 = vld [vmem:[%s5464_s17 + $0x10] sm:$0xff]  }
0x13da   : > { %4257 = vmatmul.mubr.msk.f32.vlgmr.msra.gmra.mrb[18].mxu0 %vm1135_vm11, %v3003_v56  ;;  %v4565_v56 = vld [vmem:[%s5464_s17 + $0x18] sm:$0xff]  }
0x13db   : > { %3367 = vmatprep.mubr.bf16.mxu0 %v4812_v48  ;;  %v4522_v48 = vld [vmem:[#allocation7 + $0x80] ss:$8 sps:$4 sm:$0xff]  }
0x13dc   : > { %3336 = vmatpush1.bf16.msra.mxu0 %v4522_v48 }
0x13dd   : > { %3337 = vmatprep.subr.bf16.mxu0 %v4527_v5 }
0x13e0   : > { %3338 = vmatpush1.bf16.msra.mxu0 %v4525_v7 }
0x13e1   : > { %3339 = vmatprep.subr.bf16.mxu0 %v4530_v8 }
0x13e4   : > { %3340 = vmatpush1.bf16.msra.mxu0 %v4528_v10  ;;  %v4568_v10 = vld [vmem:[%s5464_s17 + $0x30] sm:$0xff]  }
0x13e5   : > { %3341 = vmatprep.subr.bf16.mxu0 %v4533_v17 }
0x13e8   : > { %3342 = vmatpush1.bf16.msra.mxu0 %v4531_v18 }
0x13e9   : > { %3343 = vmatprep.subr.bf16.mxu0 %v4536_v19 }
0x13ec   : > { %3344 = vmatpush1.bf16.msra.mxu0 %v4534_v20 }
0x13ed   : > { %3345 = vmatprep.subr.bf16.mxu0 %v4539_v21 }
0x13f0   : > { %3346 = vmatpush1.bf16.msra.mxu0 %v4537_v22 }
0x13f1   : > { %3347 = vmatprep.subr.bf16.mxu0 %v4542_v23 }
0x13f4   : > { %3348 = vmatpush1.bf16.msra.mxu0 %v4540_v25 }
0x13f5   : > { %3349 = vmatprep.subr.bf16.mxu0 %v4545_v16 }
0x13f8   : > { %3350 = vmatpush1.bf16.msra.mxu0 %v4543_v26 }
0x13f9   : > { %4279 = vmatprep.subr.bf16.mxu0 %v4810_v0 }
0x14ad   : > { %v3074_v59 = vpop.f32.mrb[18].mxu0 }
0x14ae   : > { %v3096_v2 = vpack.c.bf16 %v3074_v59, %v3074_v59  ;;  %v4258_v4 = vpop.f32.mrb[19].mxu0  ;;  %v4567_v59 = vld [vmem:[%s5464_s17 + $0x28] sm:$0xff]  }
0x14b0   : > { %4276 = vmatmul.mubr.bf16.vlgmr.msra.gmra.mrb[28].mxu1 %v3096_v2  ;;  %v3938_v2 = vld [vmem:[%s5461_s14 + $0x2] sm:$0x3] }
0x14b1   : > { %4081 = vmatpush3.bf16.msra.mxu1 %v4547_v29  ;;  %v3248_v4 = vrot.slane %v3938_v2, %v5145_v9 }
0x14b2   : > { %4082 = vmatprep.subr.bf16.mxu1 %v4548_v31 }
0x14b5   : > { %4083 = vmatpush3.bf16.msra.mxu1 %v4549_v32 }
0x14b6   : > { %4084 = vmatprep.subr.bf16.mxu1 %v4550_v33 }
0x14b9   : > { %4085 = vmatpush3.bf16.msra.mxu1 %v4551_v34 }
0x14ba   : > { %4086 = vmatprep.subr.bf16.mxu1 %v4552_v28 }
0x14bd   : > { %4087 = vmatpush3.bf16.msra.mxu1 %v4553_v35 }
0x14be   : > { %4088 = vmatprep.subr.bf16.mxu1 %v4554_v36 }
0x14c1   : > { %4089 = vmatpush3.bf16.msra.mxu1 %v4555_v37 }
0x14c2   : > { %4090 = vmatprep.subr.bf16.mxu1 %v4556_v38 }
0x14c5   : > { %4091 = vmatpush3.bf16.msra.mxu1 %v4557_v13 }
0x14c6   : > { %4092 = vmatprep.subr.bf16.mxu1 %v4558_v50 }
0x14c9   : > { %4093 = vmatpush3.bf16.msra.mxu1 %v4559_v24 }
0x14ca   : > { %4094 = vmatprep.subr.bf16.mxu1 %v4560_v51 }
0x14cd   : > { %4095 = vmatpush3.bf16.msra.mxu1 %v4561_v52 }
0x1583   : > { %v3179_v60 = vpop.f32.mrb[28].mxu1 }
0x1584   : > { %v3185_v62 = vadd.f32 %v3179_v60, %v5242_v57  ;;  %v4277_v63 = vpop.f32.mrb[29].mxu1  ;;  %v3252_v60 = vrot.slane %v3938_v2, %v5139_v6  ;;  %v4569_v6 = vld [vmem:[%s5464_s17 + $0x38] sm:$0xff]  }
0x1585   : > { %v3182_v1 = vpop.f32.mrb[30].mxu1 }
0x1586   : > { %v5343_v42 = vadd.f32 %v3933_v61, %v3185_v62  ;;  %v4278_v12 = vpop.f32.mrb[31].mxu1 }
0x1588   : > { %3199 = vadd.xlane.f32.xlu0 %v5343_v42 }
0x1615   : > { %v3200_v57 = vpop.xlane.xlu0 %3199 }
0x1616   : > { %v3201_v11 = vmul.f32 0.0078125, %v3200_v57 }
0x1618   : > { %v3202_v14 = vsub.f32 %v5343_v42, %v3201_v11 }
0x161a   : > { %v3203_v15 = vmul.f32 %v3202_v14, %v3202_v14 }
0x161c   : > { %3204 = vadd.xlane.f32.xlu1 %v3203_v15  ;;  %v3972_v15 = vld [vmem:[%s5463_s16 + $0x1] ss:$0 sm:$0xff] }
0x16a9   : > { %v3205_v39 = vpop.xlane.xlu1 %3204 }
0x16aa   : > { %v3206_v40 = vmul.f32 0.0078125, %v3205_v39 }
0x16ac   : > { %v3207_v41 = vadd.f32 1e-05, %v3206_v40 }
0x16ae   : > { %4610 = vrsqrt.f32 %v3207_v41 }
0x16b8   : > { %v4611_v43 = vpop.eup %4610 }
0x16b9   : > { %v3209_v45 = vmul.f32 %v4611_v43, %v3202_v14 }
0x16bb   : > { %v3216_v47 = vmul.f32 %v3936_v44, %v3209_v45 }
0x16bd   : > { %v3223_v30 = vadd.f32 %v3937_v46, %v3216_v47 }
0x16bf   : > { %v3241_v49 = vpack.c.bf16 %v3223_v30, %v3223_v30 }
0x16c1   : > { %3368 = vmatmul.mubr.bf16.vlgmr.msra.gmra.mrb[24].mxu0 %v3241_v49 }
0x16c2   : > { %4295 = vmatprep.mubr.msk.bf16.mxu0 %vm4811_vm0, %v4810_v0  ;;  %4280 = vmatpush3.bf16.msra.mxu0 %v4562_v53 }
0x16c3   : > { %4281 = vmatprep.subr.bf16.mxu0 %v4810_v0 }
0x16c6   : > { %4282 = vmatpush3.bf16.msra.mxu0 %v4563_v54 }
0x16c7   : > { %4283 = vmatprep.subr.bf16.mxu0 %v4810_v0 }
0x16ca   : > { %4284 = vmatpush3.bf16.msra.mxu0 %v4564_v55 }
0x16cb   : > { %4285 = vmatprep.subr.bf16.mxu0 %v4810_v0 }
0x16ce   : > { %4286 = vmatpush3.bf16.msra.mxu0 %v4565_v56 }
0x16cf   : > { %4287 = vmatprep.subr.bf16.mxu0 %v4810_v0 }
0x16d2   : > { %4288 = vmatpush3.bf16.msra.mxu0 %v4566_v58 }
0x16d3   : > { %4289 = vmatprep.subr.bf16.mxu0 %v4810_v0 }
0x16d6   : > { %4290 = vmatpush3.bf16.msra.mxu0 %v4567_v59 }
0x16d7   : > { %4291 = vmatprep.subr.bf16.mxu0 %v4810_v0 }
0x16da   : > { %4292 = vmatpush3.bf16.msra.mxu0 %v4568_v10 }
0x16db   : > { %4293 = vmatprep.subr.bf16.mxu0 %v4810_v0  ;;  %v3973_v0 = vld [vmem:[%s5518_s26] ss:$0 sm:$0xff] }
0x16de   : > { %4294 = vmatpush3.bf16.msra.mxu0 %v4569_v6 }
0x1794   : > { %v3369_v61 = vpop.f32.mrb[24].mxu0 }
0x1795   : > { %v3370_v62 = vadd.f32 %v3369_v61, %v3248_v4  ;;  %v3371_v63 = vpop.f32.mrb[25].mxu0 }
0x1796   : > { %v3372_v1 = vadd.f32 %v3371_v63, %v3252_v60  ;;  %v3373_v12 = vpop.f32.mrb[26].mxu0 }
0x1797   : > { %v3376_v48 = vmax.f32 %v3370_v62, 0.0  ;;  %v3374_v3 = vpop.f32.mrb[27].mxu0 }
0x1798   : > { %v3377_v5 = vmax.f32 %v3372_v1, 0.0 }
0x1799   : > { %v3411_v8 = vpack.c.bf16 %v3376_v48, %v3376_v48 }
0x179a   : > { %v3412_v7 = vpack.c.bf16 %v3377_v5, %v3377_v5 }
0x179c   : > { %3541 = vmatprep.mubr.bf16.mxu1 %v3412_v7 }
0x179d   : > { %3542 = vmatmul.mubr.bf16.vlgmr.msra.gmra.mrb[32].mxu1 %v3411_v8 }
0x1870   : > { %v4096_v9 = vpop.f32.mrb[32].mxu1 }
0x1871   : > { %v4097_v57 = vpop.f32.mrb[33].mxu1 }
0x1872   : > { %v4098_v11 = vadd.f32 %v4097_v57, %v4096_v9  ;;  %v4099_v14 = vpop.f32.mrb[34].mxu1 }
0x1873   : > { %v4100_v17 = vpop.f32.mrb[35].mxu1 }
0x1874   : > { %v3549_v18 = vadd.f32 %v4098_v11, %v5343_v42 }
0x1876   : > { %v3558_v19 = vadd.f32 %v3972_v15, %v3549_v18 }
0x1878   : > { %v3575_v20 = vpack.c.bf16 %v3558_v19, %v3558_v19 }
0x187a   : > { %4296 = vmatmul.mubr.bf16.vlgmr.msra.gmra.mrb[28].mxu0 %v3575_v20 }
0x194d   : > { %v3665_v21 = vpop.f32.mrb[28].mxu0 }
0x194e   : > { %v3666_v22 = vadd.f32 %v3973_v0, %v3665_v21  ;;  %v4297_v23 = vpop.f32.mrb[29].mxu0 }
0x194f   : > { %v3668_v42 = vpop.f32.mrb[30].mxu0 }
0x1950   : > { %v4298_v25 = vpop.f32.mrb[31].mxu0  ;;  %3671 = vst.msk [vmem:[%s656_s24] sm:$0xff] %vm678_vm2, %v3666_v22 }
0x1951   : > { %4737 = shalt.err (!%p4734_p0)
}
0x1952   : > { %s4738_s18 = scalar_lea.hbm %s5404_s27, 128  ;;  %s4742_s26 = scalar_lea.hbm %s5520_s25, 256 }
0x1953   : > { %p4739_p6 = scmp.ne.s32.totalorder %s5404_s27, %s4738_s18  ;;  %p4743_p13 = scmp.lt.u32.totalorder %s5404_s27, %s5520_s25 }
0x1954   : > { %p4744_p12 = scmp.lt.u32.totalorder %s4742_s26, %s4738_s18  ;;  %p4746_p2 = scmp.lt.u32.totalorder %s4738_s18, %s5404_s27 }
0x1955   : > { %p4740_p9 = pnand %p4739_p6, %p5521_p3 }
0x1956   : > { %p4745_p1 = por %p4744_p12, %p4743_p13 }
0x1957   : > { %p4741_p10 = pneg %p4740_p9 }
0x1958   : > { %p4747_p4 = por %p4746_p2, %p4745_p1 }
0x195a   : > { %p4748_p7 = pnand %p4747_p4, %p4741_p10 }
0x195c   : > { %4751 = shalt.err (!%p4748_p7)
}
0x195d   : > { %4327 = dma.vmem_to_hbm [thread:$0]  (%p5521_p3), %s5406_s2, 128, %s5404_s27, %s3673_s1  }
0x195e PF: > { %s5522_s0 = sld [smem:[#allocation18_spill]]  ;;  %s5523_s3 = sld [smem:[#allocation15_spill]] }
0x195f   : > { %s5524_s7 = sld [smem:[#allocation22_spill]] }
0x1964   : > { %p4354_p8 = scmp.ge.s32.totalorder %s5522_s0, 2  ;;  %s3698_s22 = sand.u32 1, %s5523_s3  }
0x1965   : > { %p5525_p11 = scmp.ne.s32.totalorder %s5524_s7, 0  ;;  %s3699_s28 = scalar_lea.sflag [#allocation4], %s3698_s22 }
0x1967   : > { %p4343_p5 = pnand %p4354_p8, %p5525_p11 }
0x1969   : > { %4781 = dma.done.wait (!%p4343_p5), %s3699_s28, 128  }
0x196a   : > { %4783 = vsyncadd (!%p4343_p5), %s3699_s28, 4294967168  ;;  %s5526_s21 = sld [smem:[#allocation19_spill]]  ;;  %s5527_s0 = sld [smem:[#allocation16_spill]] }
0x196b   : > { %s5528_s30 = sld [smem:[#allocation17_spill]]  ;;  %s5529_s20 = sld [smem:[#allocation20_spill]] }
0x1970   : > { %p32_p0 = scmp.ge.s32.totalorder %s5526_s21, 4  }
0x1972   :  { %34 = sbr.rel (!%p32_p0) target bundleno = 14 (0xe), region = 160 }
0x1979   :  { %3704 = vsyncpa [#allocation3], 1 }
0x197a   :  { %3706 = vsyncpa [#allocation3 + $0x1], 1 }
0x197b   :  { %3707 = vsyncpa [#allocation6], 1 }
0x197c   :  { %3708 = vsyncpa [#allocation9], 1 }
0x197d   :  { %3709 = vsyncpa [#allocation4], 1 }
0x197e   :  { %3711 = vsyncpa [#allocation4 + $0x1], 1 }

</bundles_post_ra>
